<compile_context>
chip_gen: v7x
topology: tpu7x:2x2x1
jax: 0.10.0
libtpu: 0.0.40
codegen_flags: <defaults>
</compile_context>

<pallas_src>
import jax
import jax.numpy as jnp
from jax import lax
from jax.experimental import pallas as pl
from jax.experimental.pallas import tpu as pltpu

# ----------------------------- config ---------------------------------------
B = 2          # batch
S = 8          # sequence length
C = 5          # chars per word
EW = 32        # args.word_emb_dim
D = 32         # args.before_att_size
H = D // 2     # LSTM hidden per direction
IMG_FEAT = 2048
LABELS = 11
OUT_PAD = 128  # lane-dense padded logits width
WORD_VOCAB = 50
CHAR_VOCAB = 40
N_IMAGES = 10


# ----------------------------- fused kernel ----------------------------------
def make_fused_kernel(bsz, seq):
    """Builds the fused forward kernel for a fixed (batch, seq)."""

    def kernel(word_ref, char_ref, img_ref,
               w_word_ref, b_word_ref,
               w_att_ref, b_att_ref,
               w_ih_ref, w_hh_ref, b_lstm_ref,
               w1_ref, b1_ref, w2_ref, b2_ref,
               o_ref, fwd_ref, bwd_ref):
        t_rows, d = char_ref.shape              # T = B*S, D
        hdim = w_hh_ref.shape[0] // 2           # LSTM hidden per direction
        f32 = jnp.float32

        # ---- 1) word projection + stacked 3-modality attention --------------
        # img_ref is the image projection, already broadcast to (T, D) in the
        # wrapper (projection itself was folded into the table at prep time).
        word_e = (jnp.dot(word_ref[...], w_word_ref[...],
                          preferred_element_type=f32) + b_word_ref[...])  # (T, D)
        char_e = char_ref[...]                                             # (T, D)
        img_e = img_ref[...]                                               # (T, D)

        stacked = jnp.concatenate([word_e, char_e, img_e], axis=0)         # (3T, D)
        att = jax.nn.sigmoid(
            jnp.dot(stacked, w_att_ref[...], preferred_element_type=f32)
            + b_att_ref[...])
        a_w = att[0:t_rows]
        a_c = att[t_rows:2 * t_rows]
        a_i = att[2 * t_rows:3 * t_rows]
        # softmax over the 3 modalities, per (row, feature).  Sigmoid outputs
        # are in (0, 1) so exp cannot overflow -> no max-subtraction needed.
        e_w = jnp.exp(a_w)
        e_c = jnp.exp(a_c)
        e_i = jnp.exp(a_i)
        inv = pl.reciprocal(e_w + e_c + e_i, approx=True)
        multi = (e_w * word_e + e_c * char_e + e_i * img_e) * inv          # (T, D)

        # ---- 2) BiLSTM (hoisted input projection, stacked directions) -------
        # one (T, D) @ (D, 8H) matmul for all timesteps and both directions;
        # column layout: [i_f i_b | f_f f_b | g_f g_b | o_f o_b] (8H = 128 lanes)
        xg = (jnp.dot(multi, w_ih_ref[...], preferred_element_type=f32)
              + b_lstm_ref[...])                                           # (T, 8H)

        # Pre-select fwd/bwd inputs ONCE, off the serial recurrence chain:
        # build the time-reversed copy (row t*B+b <- row (S-1-t)*B+b) and a
        # single lane select, so the loop body only does one contiguous load.
        xg_rev = jnp.concatenate(
            [xg[(seq - 1 - tt) * bsz:(seq - tt) * bsz, :] for tt in range(seq)],
            axis=0)                                                        # (T, 8H)
        lane_t = lax.broadcasted_iota(jnp.int32, (t_rows, 8 * hdim), 1)
        xg_dir = jnp.where((lane_t % (2 * hdim)) < hdim, xg, xg_rev)       # (T, 8H)

        w_hh = w_hh_ref[...]                                               # (2H, 8H)
        h_cat = jnp.zeros((bsz, 2 * hdim), f32)      # [h_fwd | h_bwd]
        c_cat = jnp.zeros((bsz, 2 * hdim), f32)

        # TODO(synk): for large S switch to lax.fori_loop(..., unroll=True).
        for t in range(seq):
            row_f = t * bsz
            row_b = (seq - 1 - t) * bsz
            g = xg_dir[row_f:row_f + bsz, :] + jnp.dot(
                h_cat, w_hh, preferred_element_type=f32)
            i_g = jax.nn.sigmoid(g[:, 0:2 * hdim])            # [i_f | i_b]
            f_g = jax.nn.sigmoid(g[:, 2 * hdim:4 * hdim])     # [f_f | f_b]
            g_g = jnp.tanh(g[:, 4 * hdim:6 * hdim])           # [g_f | g_b]
            o_g = jax.nn.sigmoid(g[:, 6 * hdim:8 * hdim])     # [o_f | o_b]
            c_cat = f_g * c_cat + i_g * g_g
            h_cat = o_g * jnp.tanh(c_cat)
            # full-lane-width stores into per-direction slabs; the fwd/bwd
            # interleave is fixed up once after the loop.
            fwd_ref[row_f:row_f + bsz, :] = h_cat
            bwd_ref[row_b:row_b + bsz, :] = h_cat

        lane_h = lax.broadcasted_iota(jnp.int32, (t_rows, 2 * hdim), 1)
        lstm_out = jnp.where(lane_h < hdim, fwd_ref[...], bwd_ref[...])    # (T, 2H)

        # ---- 3) MLP head (lane-dense 128-wide padded logits) -----------------
        h1 = jnp.maximum(
            jnp.dot(lstm_out, w1_ref[...], preferred_element_type=f32)
            + b1_ref[...], 0.0)
        o_ref[...] = (jnp.dot(h1, w2_ref[...], preferred_element_type=f32)
                      + b2_ref[...])

    return kernel


# ----------------------------- one-time param prep ----------------------------
def prepare_params(params):
    """One-time repack of weights into kernel-ready layouts (hoisted out of
    every forward call, per performance review)."""
    d = params["w_word"].shape[1]
    h = d // 2

    # fold the image projection into the frozen image-feature table:
    # (N_IMAGES, 2048) @ (2048, D) done once; the kernel never sees w_img.
    img_proj_table = (params["image_embed"] @ params["w_img"]
                      + params["b_img"]).astype(jnp.float32)

    # BiLSTM weights: stacked fwd/bwd, gate-interleaved column layout
    # (8H lanes): [i_f i_b | f_f f_b | g_f g_b | o_f o_b]
    def gate_interleave(wf, wb):
        parts = []
        for k in range(4):
            parts.append(wf[..., k * h:(k + 1) * h])
            parts.append(wb[..., k * h:(k + 1) * h])
        return jnp.concatenate(parts, axis=-1)

    w_ih_cat = gate_interleave(params["w_ih_f"], params["w_ih_b"])    # (D, 8H)
    b_lstm_cat = gate_interleave(params["b_f"], params["b_b"])        # (1, 8H)
    # h_cat = [h_fwd | h_bwd]: fwd rows feed fwd gate cols, bwd rows bwd cols.
    w_hh_cat = jnp.zeros((2 * h, 8 * h), jnp.float32)                 # (2H, 8H)
    for k in range(4):
        w_hh_cat = w_hh_cat.at[0:h, 2 * k * h:(2 * k + 1) * h].set(
            params["w_hh_f"][:, k * h:(k + 1) * h])
        w_hh_cat = w_hh_cat.at[h:2 * h, (2 * k + 1) * h:(2 * k + 2) * h].set(
            params["w_hh_b"][:, k * h:(k + 1) * h])

    # lane-dense head: pad 11-wide logits to 128 lanes with zero columns
    w2p = jnp.zeros((params["w2"].shape[0], OUT_PAD), jnp.float32)
    w2p = w2p.at[:, :LABELS].set(params["w2"])
    b2p = jnp.zeros((1, OUT_PAD), jnp.float32).at[:, :LABELS].set(params["b2"])

    return {
        "word_embed": params["word_embed"],
        "char_embed_table": params["char_embed_table"],
        "img_proj_table": img_proj_table,
        "w_word": params["w_word"], "b_word": params["b_word"],
        "w_att": params["w_att"], "b_att": params["b_att"],
        "w_ih_cat": w_ih_cat, "w_hh_cat": w_hh_cat, "b_lstm_cat": b_lstm_cat,
        "w1": params["w1"], "b1": params["b1"],
        "w2p": w2p, "b2p": b2p,
    }


# ----------------------------- wrapper ---------------------------------------
@jax.jit
def forward(prep, word_id, char_id, img_id, char_mask):
    # ---- embedding lookups (gathers) + char masked-mean: plain JAX glue ----
    word_raw = prep["word_embed"][word_id]               # (B, S, EW)
    char_vecs = prep["char_embed_table"][char_id]        # (B, S, C, D)
    mask = char_mask.astype(jnp.float32)[..., None]
    char_e = (char_vecs * mask).sum(2) / jnp.maximum(mask.sum(2), 1.0)  # (B,S,D)
    img_proj = prep["img_proj_table"][img_id]            # (B, D)  (pre-projected)

    b, s, ew = word_raw.shape
    d = prep["w_word"].shape[1]
    t = b * s

    # time-major rows (row = t*B + b): each timestep's batch is contiguous.
    word_tm = jnp.swapaxes(word_raw, 0, 1).reshape(t, ew)
    char_tm = jnp.swapaxes(char_e, 0, 1).reshape(t, d)
    img_tm = jnp.broadcast_to(img_proj[None], (s, b, d)).reshape(t, d)

    args = (word_tm, char_tm, img_tm,
            prep["w_word"], prep["b_word"],
            prep["w_att"], prep["b_att"],
            prep["w_ih_cat"], prep["w_hh_cat"], prep["b_lstm_cat"],
            prep["w1"], prep["b1"], prep["w2p"], prep["b2p"])

    def full_spec(shape):
        nd = len(shape)
        return pl.BlockSpec(shape, lambda i, _nd=nd: (0,) * _nd)

    out_tm = pl.pallas_call(
        make_fused_kernel(b, s),
        out_shape=jax.ShapeDtypeStruct((t, OUT_PAD), jnp.float32),
        grid=(1,),                              # whole problem fits VMEM
        in_specs=[full_spec(a.shape) for a in args],
        out_specs=full_spec((t, OUT_PAD)),
        scratch_shapes=[pltpu.VMEM((t, d), jnp.float32),    # fwd hidden slab
                        pltpu.VMEM((t, d), jnp.float32)],   # bwd hidden slab
    )(*args)

    # undo time-major layout and strip lane padding
    return jnp.swapaxes(out_tm.reshape(s, b, OUT_PAD), 0, 1)[:, :, :LABELS]


# ----------------------------- pure-JAX reference ----------------------------
def reference_forward(params, word_id, char_id, img_id, char_mask):
    word_raw = params["word_embed"][word_id]
    img_feat = params["image_embed"][img_id]
    char_vecs = params["char_embed_table"][char_id]
    mask = char_mask.astype(jnp.float32)[..., None]
    char_e = (char_vecs * mask).sum(2) / jnp.maximum(mask.sum(2), 1.0)

    img_proj = img_feat @ params["w_img"] + params["b_img"]          # (B, D)
    word_e = word_raw @ params["w_word"] + params["b_word"]          # (B, S, D)
    b, s, d = word_e.shape
    img_e = jnp.broadcast_to(img_proj[:, None, :], (b, s, d))

    embed = jnp.stack([word_e, char_e, img_e], axis=2)               # (B,S,3,D)
    att = jax.nn.sigmoid(embed @ params["w_att"] + params["b_att"])
    att = jax.nn.softmax(att, axis=2)                                # over modality
    multi = (att * embed).sum(axis=2)                                # (B, S, D)

    def lstm_dir(x_bsd, w_ih, w_hh, bias, reverse):
        xs = jnp.flip(x_bsd, axis=1) if reverse else x_bsd

        def step(carry, x_t):
            hh, cc = carry
            g = x_t @ w_ih + hh @ w_hh + bias
            i_g = jax.nn.sigmoid(g[:, :H])
            f_g = jax.nn.sigmoid(g[:, H:2 * H])
            g_g = jnp.tanh(g[:, 2 * H:3 * H])
            o_g = jax.nn.sigmoid(g[:, 3 * H:])
            cc = f_g * cc + i_g * g_g
            hh = o_g * jnp.tanh(cc)
            return (hh, cc), hh

        h0 = jnp.zeros((x_bsd.shape[0], H), jnp.float32)
        c0 = jnp.zeros((x_bsd.shape[0], H), jnp.float32)
        _, ys = lax.scan(step, (h0, c0), jnp.swapaxes(xs, 0, 1))
        ys = jnp.swapaxes(ys, 0, 1)
        return jnp.flip(ys, axis=1) if reverse else ys

    fwd = lstm_dir(multi, params["w_ih_f"], params["w_hh_f"], params["b_f"], False)
    bwd = lstm_dir(multi, params["w_ih_b"], params["w_hh_b"], params["b_b"], True)
    lstm_out = jnp.concatenate([fwd, bwd], axis=-1)

    h1 = jnp.maximum(lstm_out @ params["w1"] + params["b1"], 0.0)
    return h1 @ params["w2"] + params["b2"]


# ----------------------------- params / main ---------------------------------
def init_params(key):
    ks = jax.random.split(key, 20)
    n = lambda k, shape, scale=0.1: (scale * jax.random.normal(k, shape)).astype(jnp.float32)
    return {
        # embedding tables (stand-ins for external word/char/image embed modules)
        "word_embed": n(ks[0], (WORD_VOCAB, EW), 0.5),
        "char_embed_table": n(ks[1], (CHAR_VOCAB, D), 0.5),
        "image_embed": n(ks[2], (N_IMAGES, IMG_FEAT), 0.5),
        # image_before_att / word_before_att
        "w_img": n(ks[3], (IMG_FEAT, D), 0.02),
        "b_img": n(ks[4], (1, D)),
        "w_word": n(ks[5], (EW, D)),
        "b_word": n(ks[6], (1, D)),
        # att_w
        "w_att": n(ks[7], (D, D)),
        "b_att": n(ks[8], (1, D)),
        # BiLSTM (pre-transposed: x @ W_ih, h @ W_hh; combined bias per direction)
        "w_ih_f": n(ks[9], (D, 4 * H)),
        "w_hh_f": n(ks[10], (H, 4 * H)),
        "b_f": n(ks[11], (1, 4 * H)),
        "w_ih_b": n(ks[12], (D, 4 * H)),
        "w_hh_b": n(ks[13], (H, 4 * H)),
        "b_b": n(ks[14], (1, 4 * H)),
        # output head
        "w1": n(ks[15], (D, 64)),
        "b1": n(ks[16], (1, 64)),
        "w2": n(ks[17], (64, LABELS)),
        "b2": n(ks[18], (1, LABELS)),
    }


if __name__ == "__main__":
    key = jax.random.PRNGKey(0)
    kp, k1, k2, k3, k4 = jax.random.split(key, 5)
    params = init_params(kp)
    prep = jax.block_until_ready(prepare_params(params))   # one-time weight repack

    word_id = jax.random.randint(k1, (B, S), 0, WORD_VOCAB)
    char_id = jax.random.randint(k2, (B, S, C), 0, CHAR_VOCAB)
    img_id = jax.random.randint(k3, (B,), 0, N_IMAGES)
    char_mask = (jax.random.uniform(k4, (B, S, C)) > 0.2).astype(jnp.int32)

    out = forward(prep, word_id, char_id, img_id, char_mask)
    out = jax.block_until_ready(out)
    assert out.shape == (B, S, LABELS), out.shape

    ref = reference_forward(params, word_id, char_id, img_id, char_mask)
    # tolerance slightly relaxed vs f32-exact because of the approximate EUP
    # reciprocal (pl.reciprocal(approx=True)) in the softmax denominator.
    assert jnp.allclose(out, ref, rtol=2e-3, atol=2e-3), float(jnp.abs(out - ref).max())

    print("KERNEL_OK")
</pallas_src>

<mosaic_0001>
module attributes {stable_mosaic.version = 11 : i64} {
  func.func @kernel(%arg0: i32, %arg1: memref<16x32xf32, #tpu.memory_space<vmem>>, %arg2: memref<16x32xf32, #tpu.memory_space<vmem>>, %arg3: memref<16x32xf32, #tpu.memory_space<vmem>>, %arg4: memref<32x32xf32, #tpu.memory_space<vmem>>, %arg5: memref<1x32xf32, #tpu.memory_space<vmem>>, %arg6: memref<32x32xf32, #tpu.memory_space<vmem>>, %arg7: memref<1x32xf32, #tpu.memory_space<vmem>>, %arg8: memref<32x128xf32, #tpu.memory_space<vmem>>, %arg9: memref<32x128xf32, #tpu.memory_space<vmem>>, %arg10: memref<1x128xf32, #tpu.memory_space<vmem>>, %arg11: memref<32x64xf32, #tpu.memory_space<vmem>>, %arg12: memref<1x64xf32, #tpu.memory_space<vmem>>, %arg13: memref<64x128xf32, #tpu.memory_space<vmem>>, %arg14: memref<1x128xf32, #tpu.memory_space<vmem>>, %arg15: memref<16x128xf32, #tpu.memory_space<vmem>>, %arg16: memref<16x32xf32, #tpu.memory_space<vmem>>, %arg17: memref<16x32xf32, #tpu.memory_space<vmem>>) attributes {dimension_semantics = [#tpu.dimension_semantics<arbitrary>], iteration_bounds = array<i64: 1>, scalar_prefetch = 0 : i64, scratch_operands = 2 : i64, tpu.core_type = #tpu.core_type<tc>, window_params = [{pipeline_mode = #tpu.pipeline_mode<synchronous>, transform_indices = @transform_0, window_bounds = array<i64: 16, 32>}, {pipeline_mode = #tpu.pipeline_mode<synchronous>, transform_indices = @transform_1, window_bounds = array<i64: 16, 32>}, {pipeline_mode = #tpu.pipeline_mode<synchronous>, transform_indices = @transform_2, window_bounds = array<i64: 16, 32>}, {pipeline_mode = #tpu.pipeline_mode<synchronous>, transform_indices = @transform_3, window_bounds = array<i64: 32, 32>}, {pipeline_mode = #tpu.pipeline_mode<synchronous>, transform_indices = @transform_4, window_bounds = array<i64: 1, 32>}, {pipeline_mode = #tpu.pipeline_mode<synchronous>, transform_indices = @transform_5, window_bounds = array<i64: 32, 32>}, {pipeline_mode = #tpu.pipeline_mode<synchronous>, transform_indices = @transform_6, window_bounds = array<i64: 1, 32>}, {pipeline_mode = #tpu.pipeline_mode<synchronous>, transform_indices = @transform_7, window_bounds = array<i64: 32, 128>}, {pipeline_mode = #tpu.pipeline_mode<synchronous>, transform_indices = @transform_8, window_bounds = array<i64: 32, 128>}, {pipeline_mode = #tpu.pipeline_mode<synchronous>, transform_indices = @transform_9, window_bounds = array<i64: 1, 128>}, {pipeline_mode = #tpu.pipeline_mode<synchronous>, transform_indices = @transform_10, window_bounds = array<i64: 32, 64>}, {pipeline_mode = #tpu.pipeline_mode<synchronous>, transform_indices = @transform_11, window_bounds = array<i64: 1, 64>}, {pipeline_mode = #tpu.pipeline_mode<synchronous>, transform_indices = @transform_12, window_bounds = array<i64: 64, 128>}, {pipeline_mode = #tpu.pipeline_mode<synchronous>, transform_indices = @transform_13, window_bounds = array<i64: 1, 128>}, {pipeline_mode = #tpu.pipeline_mode<synchronous>, transform_indices = @transform_14, window_bounds = array<i64: 16, 128>}]} {
    %c0 = arith.constant 0 : index
    %c0_0 = arith.constant 0 : index
    %0 = vector.load %arg1[%c0, %c0_0] : memref<16x32xf32, #tpu.memory_space<vmem>>, vector<16x32xf32>
    %c0_1 = arith.constant 0 : index
    %c0_2 = arith.constant 0 : index
    %1 = vector.load %arg4[%c0_1, %c0_2] : memref<32x32xf32, #tpu.memory_space<vmem>>, vector<32x32xf32>
    %cst = arith.constant dense<0.000000e+00> : vector<16x32xf32>
    %2 = tpu.matmul %0, %1, %cst {dimension_numbers = #tpu.dot_dimension_numbers<[1], [0], [0], [1], [0, 0, 1, 1], [], []>} : vector<16x32xf32>, vector<32x32xf32>, vector<16x32xf32> -> vector<16x32xf32>
    %c0_3 = arith.constant 0 : index
    %c0_4 = arith.constant 0 : index
    %3 = vector.load %arg5[%c0_3, %c0_4] : memref<1x32xf32, #tpu.memory_space<vmem>>, vector<1x32xf32>
    %4 = vector.broadcast %3 : vector<1x32xf32> to vector<16x32xf32>
    %5 = arith.addf %2, %4 : vector<16x32xf32>
    %c0_5 = arith.constant 0 : index
    %c0_6 = arith.constant 0 : index
    %6 = vector.load %arg2[%c0_5, %c0_6] : memref<16x32xf32, #tpu.memory_space<vmem>>, vector<16x32xf32>
    %c0_7 = arith.constant 0 : index
    %c0_8 = arith.constant 0 : index
    %7 = vector.load %arg3[%c0_7, %c0_8] : memref<16x32xf32, #tpu.memory_space<vmem>>, vector<16x32xf32>
    %8 = tpu.concatenate %5, %6, %7 in 0 : vector<16x32xf32>, vector<16x32xf32>, vector<16x32xf32> -> vector<48x32xf32>
    %c0_9 = arith.constant 0 : index
    %c0_10 = arith.constant 0 : index
    %9 = vector.load %arg6[%c0_9, %c0_10] : memref<32x32xf32, #tpu.memory_space<vmem>>, vector<32x32xf32>
    %cst_11 = arith.constant dense<0.000000e+00> : vector<48x32xf32>
    %10 = tpu.matmul %8, %9, %cst_11 {dimension_numbers = #tpu.dot_dimension_numbers<[1], [0], [0], [1], [0, 0, 1, 1], [], []>} : vector<48x32xf32>, vector<32x32xf32>, vector<48x32xf32> -> vector<48x32xf32>
    %c0_12 = arith.constant 0 : index
    %c0_13 = arith.constant 0 : index
    %11 = vector.load %arg7[%c0_12, %c0_13] : memref<1x32xf32, #tpu.memory_space<vmem>>, vector<1x32xf32>
    %12 = vector.broadcast %11 : vector<1x32xf32> to vector<48x32xf32>
    %13 = arith.addf %10, %12 : vector<48x32xf32>
    %14 = arith.negf %13 : vector<48x32xf32>
    %15 = math.exp %14 : vector<48x32xf32>
    %cst_14 = arith.constant 1.000000e+00 : f32
    %16 = vector.broadcast %cst_14 : f32 to vector<48x32xf32>
    %17 = arith.addf %16, %15 : vector<48x32xf32>
    %18 = arith.divf %16, %17 : vector<48x32xf32>
    %19 = vector.extract_strided_slice %18 {offsets = [0, 0], sizes = [16, 32], strides = [1, 1]} : vector<48x32xf32> to vector<16x32xf32>
    %20 = vector.extract_strided_slice %18 {offsets = [16, 0], sizes = [16, 32], strides = [1, 1]} : vector<48x32xf32> to vector<16x32xf32>
    %21 = vector.extract_strided_slice %18 {offsets = [32, 0], sizes = [16, 32], strides = [1, 1]} : vector<48x32xf32> to vector<16x32xf32>
    %22 = math.exp %19 : vector<16x32xf32>
    %23 = math.exp %20 : vector<16x32xf32>
    %24 = math.exp %21 : vector<16x32xf32>
    %25 = arith.addf %22, %23 : vector<16x32xf32>
    %26 = arith.addf %25, %24 : vector<16x32xf32>
    %27 = tpu.reciprocal %26 {approx = true} : vector<16x32xf32> -> vector<16x32xf32>
    %28 = arith.mulf %22, %5 : vector<16x32xf32>
    %29 = arith.mulf %23, %6 : vector<16x32xf32>
    %30 = arith.addf %28, %29 : vector<16x32xf32>
    %31 = arith.mulf %24, %7 : vector<16x32xf32>
    %32 = arith.addf %30, %31 : vector<16x32xf32>
    %33 = arith.mulf %32, %27 : vector<16x32xf32>
    %c0_15 = arith.constant 0 : index
    %c0_16 = arith.constant 0 : index
    %34 = vector.load %arg8[%c0_15, %c0_16] : memref<32x128xf32, #tpu.memory_space<vmem>>, vector<32x128xf32>
    %cst_17 = arith.constant dense<0.000000e+00> : vector<16x128xf32>
    %35 = tpu.matmul %33, %34, %cst_17 {dimension_numbers = #tpu.dot_dimension_numbers<[1], [0], [0], [1], [0, 0, 1, 1], [], []>} : vector<16x32xf32>, vector<32x128xf32>, vector<16x128xf32> -> vector<16x128xf32>
    %c0_18 = arith.constant 0 : index
    %c0_19 = arith.constant 0 : index
    %36 = vector.load %arg10[%c0_18, %c0_19] : memref<1x128xf32, #tpu.memory_space<vmem>>, vector<1x128xf32>
    %37 = vector.broadcast %36 : vector<1x128xf32> to vector<16x128xf32>
    %38 = arith.addf %35, %37 : vector<16x128xf32>
    %39 = vector.extract_strided_slice %38 {offsets = [14, 0], sizes = [2, 128], strides = [1, 1]} : vector<16x128xf32> to vector<2x128xf32>
    %40 = vector.extract_strided_slice %38 {offsets = [12, 0], sizes = [2, 128], strides = [1, 1]} : vector<16x128xf32> to vector<2x128xf32>
    %41 = vector.extract_strided_slice %38 {offsets = [10, 0], sizes = [2, 128], strides = [1, 1]} : vector<16x128xf32> to vector<2x128xf32>
    %42 = vector.extract_strided_slice %38 {offsets = [8, 0], sizes = [2, 128], strides = [1, 1]} : vector<16x128xf32> to vector<2x128xf32>
    %43 = vector.extract_strided_slice %38 {offsets = [6, 0], sizes = [2, 128], strides = [1, 1]} : vector<16x128xf32> to vector<2x128xf32>
    %44 = vector.extract_strided_slice %38 {offsets = [4, 0], sizes = [2, 128], strides = [1, 1]} : vector<16x128xf32> to vector<2x128xf32>
    %45 = vector.extract_strided_slice %38 {offsets = [2, 0], sizes = [2, 128], strides = [1, 1]} : vector<16x128xf32> to vector<2x128xf32>
    %46 = vector.extract_strided_slice %38 {offsets = [0, 0], sizes = [2, 128], strides = [1, 1]} : vector<16x128xf32> to vector<2x128xf32>
    %47 = tpu.concatenate %39, %40, %41, %42, %43, %44, %45, %46 in 0 : vector<2x128xf32>, vector<2x128xf32>, vector<2x128xf32>, vector<2x128xf32>, vector<2x128xf32>, vector<2x128xf32>, vector<2x128xf32>, vector<2x128xf32> -> vector<16x128xf32>
    %48 = tpu.iota {dimensions = array<i32: 1>} : vector<16x128xi32>
    %c32_i32 = arith.constant 32 : i32
    %c0_i32 = arith.constant 0 : i32
    %49 = arith.cmpi eq, %c32_i32, %c0_i32 : i32
    %c1_i32 = arith.constant 1 : i32
    %50 = arith.select %49, %c1_i32, %c32_i32 : i32
    %51 = vector.broadcast %50 : i32 to vector<16x128xi32>
    %52 = arith.remsi %48, %51 : vector<16x128xi32>
    %c0_i32_20 = arith.constant 0 : i32
    %53 = vector.broadcast %c0_i32_20 : i32 to vector<16x128xi32>
    %54 = arith.cmpi ne, %52, %53 : vector<16x128xi32>
    %c0_i32_21 = arith.constant 0 : i32
    %55 = vector.broadcast %c0_i32_21 : i32 to vector<16x128xi32>
    %56 = arith.cmpi slt, %52, %55 : vector<16x128xi32>
    %c0_i32_22 = arith.constant 0 : i32
    %57 = arith.cmpi slt, %50, %c0_i32_22 : i32
    %58 = vector.broadcast %57 : i1 to vector<16x128xi1>
    %59 = vector.broadcast %58 : vector<16x128xi1> to vector<16x128xi1>
    %60 = arith.xori %56, %59 : vector<16x128xi1>
    %61 = arith.andi %60, %54 : vector<16x128xi1>
    %62 = vector.broadcast %50 : i32 to vector<16x128xi32>
    %63 = arith.addi %52, %62 : vector<16x128xi32>
    %64 = arith.select %61, %63, %52 : vector<16x128xi1>, vector<16x128xi32>
    %c16_i32 = arith.constant 16 : i32
    %65 = vector.broadcast %c16_i32 : i32 to vector<16x128xi32>
    %66 = arith.cmpi slt, %64, %65 : vector<16x128xi32>
    %67 = arith.select %66, %38, %47 : vector<16x128xi1>, vector<16x128xf32>
    %c0_23 = arith.constant 0 : index
    %c0_24 = arith.constant 0 : index
    %68 = vector.load %arg9[%c0_23, %c0_24] : memref<32x128xf32, #tpu.memory_space<vmem>>, vector<32x128xf32>
    %cst_25 = arith.constant 0.000000e+00 : f32
    %69 = vector.broadcast %cst_25 : f32 to vector<2x32xf32>
    %cst_26 = arith.constant 0.000000e+00 : f32
    %70 = vector.broadcast %cst_26 : f32 to vector<2x32xf32>
    %71 = vector.extract_strided_slice %67 {offsets = [0, 0], sizes = [2, 128], strides = [1, 1]} : vector<16x128xf32> to vector<2x128xf32>
    %cst_27 = arith.constant dense<0.000000e+00> : vector<2x128xf32>
    %72 = tpu.matmul %69, %68, %cst_27 {dimension_numbers = #tpu.dot_dimension_numbers<[1], [0], [0], [1], [0, 0, 1, 1], [], []>} : vector<2x32xf32>, vector<32x128xf32>, vector<2x128xf32> -> vector<2x128xf32>
    %73 = arith.addf %71, %72 : vector<2x128xf32>
    %74 = vector.extract_strided_slice %73 {offsets = [0, 0], sizes = [2, 32], strides = [1, 1]} : vector<2x128xf32> to vector<2x32xf32>
    %75 = arith.negf %74 : vector<2x32xf32>
    %76 = math.exp %75 : vector<2x32xf32>
    %cst_28 = arith.constant 1.000000e+00 : f32
    %77 = vector.broadcast %cst_28 : f32 to vector<2x32xf32>
    %78 = arith.addf %77, %76 : vector<2x32xf32>
    %79 = arith.divf %77, %78 : vector<2x32xf32>
    %80 = vector.extract_strided_slice %73 {offsets = [0, 32], sizes = [2, 32], strides = [1, 1]} : vector<2x128xf32> to vector<2x32xf32>
    %81 = arith.negf %80 : vector<2x32xf32>
    %82 = math.exp %81 : vector<2x32xf32>
    %cst_29 = arith.constant 1.000000e+00 : f32
    %83 = vector.broadcast %cst_29 : f32 to vector<2x32xf32>
    %84 = arith.addf %83, %82 : vector<2x32xf32>
    %85 = arith.divf %83, %84 : vector<2x32xf32>
    %86 = vector.extract_strided_slice %73 {offsets = [0, 64], sizes = [2, 32], strides = [1, 1]} : vector<2x128xf32> to vector<2x32xf32>
    %87 = math.tanh %86 : vector<2x32xf32>
    %88 = vector.extract_strided_slice %73 {offsets = [0, 96], sizes = [2, 32], strides = [1, 1]} : vector<2x128xf32> to vector<2x32xf32>
    %89 = arith.negf %88 : vector<2x32xf32>
    %90 = math.exp %89 : vector<2x32xf32>
    %cst_30 = arith.constant 1.000000e+00 : f32
    %91 = vector.broadcast %cst_30 : f32 to vector<2x32xf32>
    %92 = arith.addf %91, %90 : vector<2x32xf32>
    %93 = arith.divf %91, %92 : vector<2x32xf32>
    %94 = arith.mulf %85, %70 : vector<2x32xf32>
    %95 = arith.mulf %79, %87 : vector<2x32xf32>
    %96 = arith.addf %94, %95 : vector<2x32xf32>
    %97 = math.tanh %96 : vector<2x32xf32>
    %98 = arith.mulf %93, %97 : vector<2x32xf32>
    %c0_31 = arith.constant 0 : index
    %c0_32 = arith.constant 0 : index
    %99 = vector.load %arg16[%c0_31, %c0_32] : memref<16x32xf32, #tpu.memory_space<vmem>>, vector<2x32xf32>
    tpu.vector_store %arg16[%c0_31, %c0_32], %98 {strides = array<i32>} : memref<16x32xf32, #tpu.memory_space<vmem>>, vector<2x32xf32>,
    %c14 = arith.constant 14 : index
    %c0_33 = arith.constant 0 : index
    %100 = vector.load %arg17[%c14, %c0_33] : memref<16x32xf32, #tpu.memory_space<vmem>>, vector<2x32xf32>
    tpu.vector_store %arg17[%c14, %c0_33], %98 {strides = array<i32>} : memref<16x32xf32, #tpu.memory_space<vmem>>, vector<2x32xf32>,
    %101 = vector.extract_strided_slice %67 {offsets = [2, 0], sizes = [2, 128], strides = [1, 1]} : vector<16x128xf32> to vector<2x128xf32>
    %cst_34 = arith.constant dense<0.000000e+00> : vector<2x128xf32>
    %102 = tpu.matmul %98, %68, %cst_34 {dimension_numbers = #tpu.dot_dimension_numbers<[1], [0], [0], [1], [0, 0, 1, 1], [], []>} : vector<2x32xf32>, vector<32x128xf32>, vector<2x128xf32> -> vector<2x128xf32>
    %103 = arith.addf %101, %102 : vector<2x128xf32>
    %104 = vector.extract_strided_slice %103 {offsets = [0, 0], sizes = [2, 32], strides = [1, 1]} : vector<2x128xf32> to vector<2x32xf32>
    %105 = arith.negf %104 : vector<2x32xf32>
    %106 = math.exp %105 : vector<2x32xf32>
    %cst_35 = arith.constant 1.000000e+00 : f32
    %107 = vector.broadcast %cst_35 : f32 to vector<2x32xf32>
    %108 = arith.addf %107, %106 : vector<2x32xf32>
    %109 = arith.divf %107, %108 : vector<2x32xf32>
    %110 = vector.extract_strided_slice %103 {offsets = [0, 32], sizes = [2, 32], strides = [1, 1]} : vector<2x128xf32> to vector<2x32xf32>
    %111 = arith.negf %110 : vector<2x32xf32>
    %112 = math.exp %111 : vector<2x32xf32>
    %cst_36 = arith.constant 1.000000e+00 : f32
    %113 = vector.broadcast %cst_36 : f32 to vector<2x32xf32>
    %114 = arith.addf %113, %112 : vector<2x32xf32>
    %115 = arith.divf %113, %114 : vector<2x32xf32>
    %116 = vector.extract_strided_slice %103 {offsets = [0, 64], sizes = [2, 32], strides = [1, 1]} : vector<2x128xf32> to vector<2x32xf32>
    %117 = math.tanh %116 : vector<2x32xf32>
    %118 = vector.extract_strided_slice %103 {offsets = [0, 96], sizes = [2, 32], strides = [1, 1]} : vector<2x128xf32> to vector<2x32xf32>
    %119 = arith.negf %118 : vector<2x32xf32>
    %120 = math.exp %119 : vector<2x32xf32>
    %cst_37 = arith.constant 1.000000e+00 : f32
    %121 = vector.broadcast %cst_37 : f32 to vector<2x32xf32>
    %122 = arith.addf %121, %120 : vector<2x32xf32>
    %123 = arith.divf %121, %122 : vector<2x32xf32>
    %124 = arith.mulf %115, %96 : vector<2x32xf32>
    %125 = arith.mulf %109, %117 : vector<2x32xf32>
    %126 = arith.addf %124, %125 : vector<2x32xf32>
    %127 = math.tanh %126 : vector<2x32xf32>
    %128 = arith.mulf %123, %127 : vector<2x32xf32>
    %c2 = arith.constant 2 : index
    %c0_38 = arith.constant 0 : index
    %129 = vector.load %arg16[%c2, %c0_38] : memref<16x32xf32, #tpu.memory_space<vmem>>, vector<2x32xf32>
    tpu.vector_store %arg16[%c2, %c0_38], %128 {strides = array<i32>} : memref<16x32xf32, #tpu.memory_space<vmem>>, vector<2x32xf32>,
    %c12 = arith.constant 12 : index
    %c0_39 = arith.constant 0 : index
    %130 = vector.load %arg17[%c12, %c0_39] : memref<16x32xf32, #tpu.memory_space<vmem>>, vector<2x32xf32>
    tpu.vector_store %arg17[%c12, %c0_39], %128 {strides = array<i32>} : memref<16x32xf32, #tpu.memory_space<vmem>>, vector<2x32xf32>,
    %131 = vector.extract_strided_slice %67 {offsets = [4, 0], sizes = [2, 128], strides = [1, 1]} : vector<16x128xf32> to vector<2x128xf32>
    %cst_40 = arith.constant dense<0.000000e+00> : vector<2x128xf32>
    %132 = tpu.matmul %128, %68, %cst_40 {dimension_numbers = #tpu.dot_dimension_numbers<[1], [0], [0], [1], [0, 0, 1, 1], [], []>} : vector<2x32xf32>, vector<32x128xf32>, vector<2x128xf32> -> vector<2x128xf32>
    %133 = arith.addf %131, %132 : vector<2x128xf32>
    %134 = vector.extract_strided_slice %133 {offsets = [0, 0], sizes = [2, 32], strides = [1, 1]} : vector<2x128xf32> to vector<2x32xf32>
    %135 = arith.negf %134 : vector<2x32xf32>
    %136 = math.exp %135 : vector<2x32xf32>
    %cst_41 = arith.constant 1.000000e+00 : f32
    %137 = vector.broadcast %cst_41 : f32 to vector<2x32xf32>
    %138 = arith.addf %137, %136 : vector<2x32xf32>
    %139 = arith.divf %137, %138 : vector<2x32xf32>
    %140 = vector.extract_strided_slice %133 {offsets = [0, 32], sizes = [2, 32], strides = [1, 1]} : vector<2x128xf32> to vector<2x32xf32>
    %141 = arith.negf %140 : vector<2x32xf32>
    %142 = math.exp %141 : vector<2x32xf32>
    %cst_42 = arith.constant 1.000000e+00 : f32
    %143 = vector.broadcast %cst_42 : f32 to vector<2x32xf32>
    %144 = arith.addf %143, %142 : vector<2x32xf32>
    %145 = arith.divf %143, %144 : vector<2x32xf32>
    %146 = vector.extract_strided_slice %133 {offsets = [0, 64], sizes = [2, 32], strides = [1, 1]} : vector<2x128xf32> to vector<2x32xf32>
    %147 = math.tanh %146 : vector<2x32xf32>
    %148 = vector.extract_strided_slice %133 {offsets = [0, 96], sizes = [2, 32], strides = [1, 1]} : vector<2x128xf32> to vector<2x32xf32>
    %149 = arith.negf %148 : vector<2x32xf32>
    %150 = math.exp %149 : vector<2x32xf32>
    %cst_43 = arith.constant 1.000000e+00 : f32
    %151 = vector.broadcast %cst_43 : f32 to vector<2x32xf32>
    %152 = arith.addf %151, %150 : vector<2x32xf32>
    %153 = arith.divf %151, %152 : vector<2x32xf32>
    %154 = arith.mulf %145, %126 : vector<2x32xf32>
    %155 = arith.mulf %139, %147 : vector<2x32xf32>
    %156 = arith.addf %154, %155 : vector<2x32xf32>
    %157 = math.tanh %156 : vector<2x32xf32>
    %158 = arith.mulf %153, %157 : vector<2x32xf32>
    %c4 = arith.constant 4 : index
    %c0_44 = arith.constant 0 : index
    %159 = vector.load %arg16[%c4, %c0_44] : memref<16x32xf32, #tpu.memory_space<vmem>>, vector<2x32xf32>
    tpu.vector_store %arg16[%c4, %c0_44], %158 {strides = array<i32>} : memref<16x32xf32, #tpu.memory_space<vmem>>, vector<2x32xf32>,
    %c10 = arith.constant 10 : index
    %c0_45 = arith.constant 0 : index
    %160 = vector.load %arg17[%c10, %c0_45] : memref<16x32xf32, #tpu.memory_space<vmem>>, vector<2x32xf32>
    tpu.vector_store %arg17[%c10, %c0_45], %158 {strides = array<i32>} : memref<16x32xf32, #tpu.memory_space<vmem>>, vector<2x32xf32>,
    %161 = vector.extract_strided_slice %67 {offsets = [6, 0], sizes = [2, 128], strides = [1, 1]} : vector<16x128xf32> to vector<2x128xf32>
    %cst_46 = arith.constant dense<0.000000e+00> : vector<2x128xf32>
    %162 = tpu.matmul %158, %68, %cst_46 {dimension_numbers = #tpu.dot_dimension_numbers<[1], [0], [0], [1], [0, 0, 1, 1], [], []>} : vector<2x32xf32>, vector<32x128xf32>, vector<2x128xf32> -> vector<2x128xf32>
    %163 = arith.addf %161, %162 : vector<2x128xf32>
    %164 = vector.extract_strided_slice %163 {offsets = [0, 0], sizes = [2, 32], strides = [1, 1]} : vector<2x128xf32> to vector<2x32xf32>
    %165 = arith.negf %164 : vector<2x32xf32>
    %166 = math.exp %165 : vector<2x32xf32>
    %cst_47 = arith.constant 1.000000e+00 : f32
    %167 = vector.broadcast %cst_47 : f32 to vector<2x32xf32>
    %168 = arith.addf %167, %166 : vector<2x32xf32>
    %169 = arith.divf %167, %168 : vector<2x32xf32>
    %170 = vector.extract_strided_slice %163 {offsets = [0, 32], sizes = [2, 32], strides = [1, 1]} : vector<2x128xf32> to vector<2x32xf32>
    %171 = arith.negf %170 : vector<2x32xf32>
    %172 = math.exp %171 : vector<2x32xf32>
    %cst_48 = arith.constant 1.000000e+00 : f32
    %173 = vector.broadcast %cst_48 : f32 to vector<2x32xf32>
    %174 = arith.addf %173, %172 : vector<2x32xf32>
    %175 = arith.divf %173, %174 : vector<2x32xf32>
    %176 = vector.extract_strided_slice %163 {offsets = [0, 64], sizes = [2, 32], strides = [1, 1]} : vector<2x128xf32> to vector<2x32xf32>
    %177 = math.tanh %176 : vector<2x32xf32>
    %178 = vector.extract_strided_slice %163 {offsets = [0, 96], sizes = [2, 32], strides = [1, 1]} : vector<2x128xf32> to vector<2x32xf32>
    %179 = arith.negf %178 : vector<2x32xf32>
    %180 = math.exp %179 : vector<2x32xf32>
    %cst_49 = arith.constant 1.000000e+00 : f32
    %181 = vector.broadcast %cst_49 : f32 to vector<2x32xf32>
    %182 = arith.addf %181, %180 : vector<2x32xf32>
    %183 = arith.divf %181, %182 : vector<2x32xf32>
    %184 = arith.mulf %175, %156 : vector<2x32xf32>
    %185 = arith.mulf %169, %177 : vector<2x32xf32>
    %186 = arith.addf %184, %185 : vector<2x32xf32>
    %187 = math.tanh %186 : vector<2x32xf32>
    %188 = arith.mulf %183, %187 : vector<2x32xf32>
    %c6 = arith.constant 6 : index
    %c0_50 = arith.constant 0 : index
    %189 = vector.load %arg16[%c6, %c0_50] : memref<16x32xf32, #tpu.memory_space<vmem>>, vector<2x32xf32>
    tpu.vector_store %arg16[%c6, %c0_50], %188 {strides = array<i32>} : memref<16x32xf32, #tpu.memory_space<vmem>>, vector<2x32xf32>,
    %c8 = arith.constant 8 : index
    %c0_51 = arith.constant 0 : index
    %190 = vector.load %arg17[%c8, %c0_51] : memref<16x32xf32, #tpu.memory_space<vmem>>, vector<2x32xf32>
    tpu.vector_store %arg17[%c8, %c0_51], %188 {strides = array<i32>} : memref<16x32xf32, #tpu.memory_space<vmem>>, vector<2x32xf32>,
    %191 = vector.extract_strided_slice %67 {offsets = [8, 0], sizes = [2, 128], strides = [1, 1]} : vector<16x128xf32> to vector<2x128xf32>
    %cst_52 = arith.constant dense<0.000000e+00> : vector<2x128xf32>
    %192 = tpu.matmul %188, %68, %cst_52 {dimension_numbers = #tpu.dot_dimension_numbers<[1], [0], [0], [1], [0, 0, 1, 1], [], []>} : vector<2x32xf32>, vector<32x128xf32>, vector<2x128xf32> -> vector<2x128xf32>
    %193 = arith.addf %191, %192 : vector<2x128xf32>
    %194 = vector.extract_strided_slice %193 {offsets = [0, 0], sizes = [2, 32], strides = [1, 1]} : vector<2x128xf32> to vector<2x32xf32>
    %195 = arith.negf %194 : vector<2x32xf32>
    %196 = math.exp %195 : vector<2x32xf32>
    %cst_53 = arith.constant 1.000000e+00 : f32
    %197 = vector.broadcast %cst_53 : f32 to vector<2x32xf32>
    %198 = arith.addf %197, %196 : vector<2x32xf32>
    %199 = arith.divf %197, %198 : vector<2x32xf32>
    %200 = vector.extract_strided_slice %193 {offsets = [0, 32], sizes = [2, 32], strides = [1, 1]} : vector<2x128xf32> to vector<2x32xf32>
    %201 = arith.negf %200 : vector<2x32xf32>
    %202 = math.exp %201 : vector<2x32xf32>
    %cst_54 = arith.constant 1.000000e+00 : f32
    %203 = vector.broadcast %cst_54 : f32 to vector<2x32xf32>
    %204 = arith.addf %203, %202 : vector<2x32xf32>
    %205 = arith.divf %203, %204 : vector<2x32xf32>
    %206 = vector.extract_strided_slice %193 {offsets = [0, 64], sizes = [2, 32], strides = [1, 1]} : vector<2x128xf32> to vector<2x32xf32>
    %207 = math.tanh %206 : vector<2x32xf32>
    %208 = vector.extract_strided_slice %193 {offsets = [0, 96], sizes = [2, 32], strides = [1, 1]} : vector<2x128xf32> to vector<2x32xf32>
    %209 = arith.negf %208 : vector<2x32xf32>
    %210 = math.exp %209 : vector<2x32xf32>
    %cst_55 = arith.constant 1.000000e+00 : f32
    %211 = vector.broadcast %cst_55 : f32 to vector<2x32xf32>
    %212 = arith.addf %211, %210 : vector<2x32xf32>
    %213 = arith.divf %211, %212 : vector<2x32xf32>
    %214 = arith.mulf %205, %186 : vector<2x32xf32>
    %215 = arith.mulf %199, %207 : vector<2x32xf32>
    %216 = arith.addf %214, %215 : vector<2x32xf32>
    %217 = math.tanh %216 : vector<2x32xf32>
    %218 = arith.mulf %213, %217 : vector<2x32xf32>
    %c8_56 = arith.constant 8 : index
    %c0_57 = arith.constant 0 : index
    %219 = vector.load %arg16[%c8_56, %c0_57] : memref<16x32xf32, #tpu.memory_space<vmem>>, vector<2x32xf32>
    tpu.vector_store %arg16[%c8_56, %c0_57], %218 {strides = array<i32>} : memref<16x32xf32, #tpu.memory_space<vmem>>, vector<2x32xf32>,
    %c6_58 = arith.constant 6 : index
    %c0_59 = arith.constant 0 : index
    %220 = vector.load %arg17[%c6_58, %c0_59] : memref<16x32xf32, #tpu.memory_space<vmem>>, vector<2x32xf32>
    tpu.vector_store %arg17[%c6_58, %c0_59], %218 {strides = array<i32>} : memref<16x32xf32, #tpu.memory_space<vmem>>, vector<2x32xf32>,
    %221 = vector.extract_strided_slice %67 {offsets = [10, 0], sizes = [2, 128], strides = [1, 1]} : vector<16x128xf32> to vector<2x128xf32>
    %cst_60 = arith.constant dense<0.000000e+00> : vector<2x128xf32>
    %222 = tpu.matmul %218, %68, %cst_60 {dimension_numbers = #tpu.dot_dimension_numbers<[1], [0], [0], [1], [0, 0, 1, 1], [], []>} : vector<2x32xf32>, vector<32x128xf32>, vector<2x128xf32> -> vector<2x128xf32>
    %223 = arith.addf %221, %222 : vector<2x128xf32>
    %224 = vector.extract_strided_slice %223 {offsets = [0, 0], sizes = [2, 32], strides = [1, 1]} : vector<2x128xf32> to vector<2x32xf32>
    %225 = arith.negf %224 : vector<2x32xf32>
    %226 = math.exp %225 : vector<2x32xf32>
    %cst_61 = arith.constant 1.000000e+00 : f32
    %227 = vector.broadcast %cst_61 : f32 to vector<2x32xf32>
    %228 = arith.addf %227, %226 : vector<2x32xf32>
    %229 = arith.divf %227, %228 : vector<2x32xf32>
    %230 = vector.extract_strided_slice %223 {offsets = [0, 32], sizes = [2, 32], strides = [1, 1]} : vector<2x128xf32> to vector<2x32xf32>
    %231 = arith.negf %230 : vector<2x32xf32>
    %232 = math.exp %231 : vector<2x32xf32>
    %cst_62 = arith.constant 1.000000e+00 : f32
    %233 = vector.broadcast %cst_62 : f32 to vector<2x32xf32>
    %234 = arith.addf %233, %232 : vector<2x32xf32>
    %235 = arith.divf %233, %234 : vector<2x32xf32>
    %236 = vector.extract_strided_slice %223 {offsets = [0, 64], sizes = [2, 32], strides = [1, 1]} : vector<2x128xf32> to vector<2x32xf32>
    %237 = math.tanh %236 : vector<2x32xf32>
    %238 = vector.extract_strided_slice %223 {offsets = [0, 96], sizes = [2, 32], strides = [1, 1]} : vector<2x128xf32> to vector<2x32xf32>
    %239 = arith.negf %238 : vector<2x32xf32>
    %240 = math.exp %239 : vector<2x32xf32>
    %cst_63 = arith.constant 1.000000e+00 : f32
    %241 = vector.broadcast %cst_63 : f32 to vector<2x32xf32>
    %242 = arith.addf %241, %240 : vector<2x32xf32>
    %243 = arith.divf %241, %242 : vector<2x32xf32>
    %244 = arith.mulf %235, %216 : vector<2x32xf32>
    %245 = arith.mulf %229, %237 : vector<2x32xf32>
    %246 = arith.addf %244, %245 : vector<2x32xf32>
    %247 = math.tanh %246 : vector<2x32xf32>
    %248 = arith.mulf %243, %247 : vector<2x32xf32>
    %c10_64 = arith.constant 10 : index
    %c0_65 = arith.constant 0 : index
    %249 = vector.load %arg16[%c10_64, %c0_65] : memref<16x32xf32, #tpu.memory_space<vmem>>, vector<2x32xf32>
    tpu.vector_store %arg16[%c10_64, %c0_65], %248 {strides = array<i32>} : memref<16x32xf32, #tpu.memory_space<vmem>>, vector<2x32xf32>,
    %c4_66 = arith.constant 4 : index
    %c0_67 = arith.constant 0 : index
    %250 = vector.load %arg17[%c4_66, %c0_67] : memref<16x32xf32, #tpu.memory_space<vmem>>, vector<2x32xf32>
    tpu.vector_store %arg17[%c4_66, %c0_67], %248 {strides = array<i32>} : memref<16x32xf32, #tpu.memory_space<vmem>>, vector<2x32xf32>,
    %251 = vector.extract_strided_slice %67 {offsets = [12, 0], sizes = [2, 128], strides = [1, 1]} : vector<16x128xf32> to vector<2x128xf32>
    %cst_68 = arith.constant dense<0.000000e+00> : vector<2x128xf32>
    %252 = tpu.matmul %248, %68, %cst_68 {dimension_numbers = #tpu.dot_dimension_numbers<[1], [0], [0], [1], [0, 0, 1, 1], [], []>} : vector<2x32xf32>, vector<32x128xf32>, vector<2x128xf32> -> vector<2x128xf32>
    %253 = arith.addf %251, %252 : vector<2x128xf32>
    %254 = vector.extract_strided_slice %253 {offsets = [0, 0], sizes = [2, 32], strides = [1, 1]} : vector<2x128xf32> to vector<2x32xf32>
    %255 = arith.negf %254 : vector<2x32xf32>
    %256 = math.exp %255 : vector<2x32xf32>
    %cst_69 = arith.constant 1.000000e+00 : f32
    %257 = vector.broadcast %cst_69 : f32 to vector<2x32xf32>
    %258 = arith.addf %257, %256 : vector<2x32xf32>
    %259 = arith.divf %257, %258 : vector<2x32xf32>
    %260 = vector.extract_strided_slice %253 {offsets = [0, 32], sizes = [2, 32], strides = [1, 1]} : vector<2x128xf32> to vector<2x32xf32>
    %261 = arith.negf %260 : vector<2x32xf32>
    %262 = math.exp %261 : vector<2x32xf32>
    %cst_70 = arith.constant 1.000000e+00 : f32
    %263 = vector.broadcast %cst_70 : f32 to vector<2x32xf32>
    %264 = arith.addf %263, %262 : vector<2x32xf32>
    %265 = arith.divf %263, %264 : vector<2x32xf32>
    %266 = vector.extract_strided_slice %253 {offsets = [0, 64], sizes = [2, 32], strides = [1, 1]} : vector<2x128xf32> to vector<2x32xf32>
    %267 = math.tanh %266 : vector<2x32xf32>
    %268 = vector.extract_strided_slice %253 {offsets = [0, 96], sizes = [2, 32], strides = [1, 1]} : vector<2x128xf32> to vector<2x32xf32>
    %269 = arith.negf %268 : vector<2x32xf32>
    %270 = math.exp %269 : vector<2x32xf32>
    %cst_71 = arith.constant 1.000000e+00 : f32
    %271 = vector.broadcast %cst_71 : f32 to vector<2x32xf32>
    %272 = arith.addf %271, %270 : vector<2x32xf32>
    %273 = arith.divf %271, %272 : vector<2x32xf32>
    %274 = arith.mulf %265, %246 : vector<2x32xf32>
    %275 = arith.mulf %259, %267 : vector<2x32xf32>
    %276 = arith.addf %274, %275 : vector<2x32xf32>
    %277 = math.tanh %276 : vector<2x32xf32>
    %278 = arith.mulf %273, %277 : vector<2x32xf32>
    %c12_72 = arith.constant 12 : index
    %c0_73 = arith.constant 0 : index
    %279 = vector.load %arg16[%c12_72, %c0_73] : memref<16x32xf32, #tpu.memory_space<vmem>>, vector<2x32xf32>
    tpu.vector_store %arg16[%c12_72, %c0_73], %278 {strides = array<i32>} : memref<16x32xf32, #tpu.memory_space<vmem>>, vector<2x32xf32>,
    %c2_74 = arith.constant 2 : index
    %c0_75 = arith.constant 0 : index
    %280 = vector.load %arg17[%c2_74, %c0_75] : memref<16x32xf32, #tpu.memory_space<vmem>>, vector<2x32xf32>
    tpu.vector_store %arg17[%c2_74, %c0_75], %278 {strides = array<i32>} : memref<16x32xf32, #tpu.memory_space<vmem>>, vector<2x32xf32>,
    %281 = vector.extract_strided_slice %67 {offsets = [14, 0], sizes = [2, 128], strides = [1, 1]} : vector<16x128xf32> to vector<2x128xf32>
    %cst_76 = arith.constant dense<0.000000e+00> : vector<2x128xf32>
    %282 = tpu.matmul %278, %68, %cst_76 {dimension_numbers = #tpu.dot_dimension_numbers<[1], [0], [0], [1], [0, 0, 1, 1], [], []>} : vector<2x32xf32>, vector<32x128xf32>, vector<2x128xf32> -> vector<2x128xf32>
    %283 = arith.addf %281, %282 : vector<2x128xf32>
    %284 = vector.extract_strided_slice %283 {offsets = [0, 0], sizes = [2, 32], strides = [1, 1]} : vector<2x128xf32> to vector<2x32xf32>
    %285 = arith.negf %284 : vector<2x32xf32>
    %286 = math.exp %285 : vector<2x32xf32>
    %cst_77 = arith.constant 1.000000e+00 : f32
    %287 = vector.broadcast %cst_77 : f32 to vector<2x32xf32>
    %288 = arith.addf %287, %286 : vector<2x32xf32>
    %289 = arith.divf %287, %288 : vector<2x32xf32>
    %290 = vector.extract_strided_slice %283 {offsets = [0, 32], sizes = [2, 32], strides = [1, 1]} : vector<2x128xf32> to vector<2x32xf32>
    %291 = arith.negf %290 : vector<2x32xf32>
    %292 = math.exp %291 : vector<2x32xf32>
    %cst_78 = arith.constant 1.000000e+00 : f32
    %293 = vector.broadcast %cst_78 : f32 to vector<2x32xf32>
    %294 = arith.addf %293, %292 : vector<2x32xf32>
    %295 = arith.divf %293, %294 : vector<2x32xf32>
    %296 = vector.extract_strided_slice %283 {offsets = [0, 64], sizes = [2, 32], strides = [1, 1]} : vector<2x128xf32> to vector<2x32xf32>
    %297 = math.tanh %296 : vector<2x32xf32>
    %298 = vector.extract_strided_slice %283 {offsets = [0, 96], sizes = [2, 32], strides = [1, 1]} : vector<2x128xf32> to vector<2x32xf32>
    %299 = arith.negf %298 : vector<2x32xf32>
    %300 = math.exp %299 : vector<2x32xf32>
    %cst_79 = arith.constant 1.000000e+00 : f32
    %301 = vector.broadcast %cst_79 : f32 to vector<2x32xf32>
    %302 = arith.addf %301, %300 : vector<2x32xf32>
    %303 = arith.divf %301, %302 : vector<2x32xf32>
    %304 = arith.mulf %295, %276 : vector<2x32xf32>
    %305 = arith.mulf %289, %297 : vector<2x32xf32>
    %306 = arith.addf %304, %305 : vector<2x32xf32>
    %307 = math.tanh %306 : vector<2x32xf32>
    %308 = arith.mulf %303, %307 : vector<2x32xf32>
    %c14_80 = arith.constant 14 : index
    %c0_81 = arith.constant 0 : index
    %309 = vector.load %arg16[%c14_80, %c0_81] : memref<16x32xf32, #tpu.memory_space<vmem>>, vector<2x32xf32>
    tpu.vector_store %arg16[%c14_80, %c0_81], %308 {strides = array<i32>} : memref<16x32xf32, #tpu.memory_space<vmem>>, vector<2x32xf32>,
    %c0_82 = arith.constant 0 : index
    %c0_83 = arith.constant 0 : index
    %310 = vector.load %arg17[%c0_82, %c0_83] : memref<16x32xf32, #tpu.memory_space<vmem>>, vector<2x32xf32>
    tpu.vector_store %arg17[%c0_82, %c0_83], %308 {strides = array<i32>} : memref<16x32xf32, #tpu.memory_space<vmem>>, vector<2x32xf32>,
    %311 = tpu.iota {dimensions = array<i32: 1>} : vector<16x32xi32>
    %c16_i32_84 = arith.constant 16 : i32
    %312 = vector.broadcast %c16_i32_84 : i32 to vector<16x32xi32>
    %313 = arith.cmpi slt, %311, %312 : vector<16x32xi32>
    %c0_85 = arith.constant 0 : index
    %c0_86 = arith.constant 0 : index
    %314 = vector.load %arg16[%c0_85, %c0_86] : memref<16x32xf32, #tpu.memory_space<vmem>>, vector<16x32xf32>
    %c0_87 = arith.constant 0 : index
    %c0_88 = arith.constant 0 : index
    %315 = vector.load %arg17[%c0_87, %c0_88] : memref<16x32xf32, #tpu.memory_space<vmem>>, vector<16x32xf32>
    %316 = arith.select %313, %314, %315 : vector<16x32xi1>, vector<16x32xf32>
    %c0_89 = arith.constant 0 : index
    %c0_90 = arith.constant 0 : index
    %317 = vector.load %arg11[%c0_89, %c0_90] : memref<32x64xf32, #tpu.memory_space<vmem>>, vector<32x64xf32>
    %cst_91 = arith.constant dense<0.000000e+00> : vector<16x64xf32>
    %318 = tpu.matmul %316, %317, %cst_91 {dimension_numbers = #tpu.dot_dimension_numbers<[1], [0], [0], [1], [0, 0, 1, 1], [], []>} : vector<16x32xf32>, vector<32x64xf32>, vector<16x64xf32> -> vector<16x64xf32>
    %c0_92 = arith.constant 0 : index
    %c0_93 = arith.constant 0 : index
    %319 = vector.load %arg12[%c0_92, %c0_93] : memref<1x64xf32, #tpu.memory_space<vmem>>, vector<1x64xf32>
    %320 = vector.broadcast %319 : vector<1x64xf32> to vector<16x64xf32>
    %321 = arith.addf %318, %320 : vector<16x64xf32>
    %cst_94 = arith.constant 0.000000e+00 : f32
    %322 = vector.broadcast %cst_94 : f32 to vector<16x64xf32>
    %323 = arith.maximumf %321, %322 : vector<16x64xf32>
    %c0_95 = arith.constant 0 : index
    %c0_96 = arith.constant 0 : index
    %324 = vector.load %arg13[%c0_95, %c0_96] : memref<64x128xf32, #tpu.memory_space<vmem>>, vector<64x128xf32>
    %cst_97 = arith.constant dense<0.000000e+00> : vector<16x128xf32>
    %325 = tpu.matmul %323, %324, %cst_97 {dimension_numbers = #tpu.dot_dimension_numbers<[1], [0], [0], [1], [0, 0, 1, 1], [], []>} : vector<16x64xf32>, vector<64x128xf32>, vector<16x128xf32> -> vector<16x128xf32>
    %c0_98 = arith.constant 0 : index
    %c0_99 = arith.constant 0 : index
    %326 = vector.load %arg14[%c0_98, %c0_99] : memref<1x128xf32, #tpu.memory_space<vmem>>, vector<1x128xf32>
    %327 = vector.broadcast %326 : vector<1x128xf32> to vector<16x128xf32>
    %328 = arith.addf %325, %327 : vector<16x128xf32>
    %c0_100 = arith.constant 0 : index
    %c0_101 = arith.constant 0 : index
    %329 = vector.load %arg15[%c0_100, %c0_101] : memref<16x128xf32, #tpu.memory_space<vmem>>, vector<16x128xf32>
    tpu.vector_store %arg15[%c0_100, %c0_101], %328 {strides = array<i32>} : memref<16x128xf32, #tpu.memory_space<vmem>>, vector<16x128xf32>,
    return
  }
  func.func @transform_0(%arg0: i32) -> (i32, i32) {
    %c0_i32 = arith.constant 0 : i32
    %c0_i32_0 = arith.constant 0 : i32
    %c0_i32_1 = arith.constant 0 : i32
    return %c0_i32, %c0_i32_0 : i32, i32
  }
  func.func @transform_1(%arg0: i32) -> (i32, i32) {
    %c0_i32 = arith.constant 0 : i32
    %c0_i32_0 = arith.constant 0 : i32
    %c0_i32_1 = arith.constant 0 : i32
    return %c0_i32, %c0_i32_0 : i32, i32
  }
  func.func @transform_2(%arg0: i32) -> (i32, i32) {
    %c0_i32 = arith.constant 0 : i32
    %c0_i32_0 = arith.constant 0 : i32
    %c0_i32_1 = arith.constant 0 : i32
    return %c0_i32, %c0_i32_0 : i32, i32
  }
  func.func @transform_3(%arg0: i32) -> (i32, i32) {
    %c0_i32 = arith.constant 0 : i32
    %c0_i32_0 = arith.constant 0 : i32
    %c0_i32_1 = arith.constant 0 : i32
    return %c0_i32, %c0_i32_0 : i32, i32
  }
  func.func @transform_4(%arg0: i32) -> (i32, i32) {
    %c0_i32 = arith.constant 0 : i32
    %c0_i32_0 = arith.constant 0 : i32
    %c0_i32_1 = arith.constant 0 : i32
    return %c0_i32, %c0_i32_0 : i32, i32
  }
  func.func @transform_5(%arg0: i32) -> (i32, i32) {
    %c0_i32 = arith.constant 0 : i32
    %c0_i32_0 = arith.constant 0 : i32
    %c0_i32_1 = arith.constant 0 : i32
    return %c0_i32, %c0_i32_0 : i32, i32
  }
  func.func @transform_6(%arg0: i32) -> (i32, i32) {
    %c0_i32 = arith.constant 0 : i32
    %c0_i32_0 = arith.constant 0 : i32
    %c0_i32_1 = arith.constant 0 : i32
    return %c0_i32, %c0_i32_0 : i32, i32
  }
  func.func @transform_7(%arg0: i32) -> (i32, i32) {
    %c0_i32 = arith.constant 0 : i32
    %c0_i32_0 = arith.constant 0 : i32
    %c0_i32_1 = arith.constant 0 : i32
    return %c0_i32, %c0_i32_0 : i32, i32
  }
  func.func @transform_8(%arg0: i32) -> (i32, i32) {
    %c0_i32 = arith.constant 0 : i32
    %c0_i32_0 = arith.constant 0 : i32
    %c0_i32_1 = arith.constant 0 : i32
    return %c0_i32, %c0_i32_0 : i32, i32
  }
  func.func @transform_9(%arg0: i32) -> (i32, i32) {
    %c0_i32 = arith.constant 0 : i32
    %c0_i32_0 = arith.constant 0 : i32
    %c0_i32_1 = arith.constant 0 : i32
    return %c0_i32, %c0_i32_0 : i32, i32
  }
  func.func @transform_10(%arg0: i32) -> (i32, i32) {
    %c0_i32 = arith.constant 0 : i32
    %c0_i32_0 = arith.constant 0 : i32
    %c0_i32_1 = arith.constant 0 : i32
    return %c0_i32, %c0_i32_0 : i32, i32
  }
  func.func @transform_11(%arg0: i32) -> (i32, i32) {
    %c0_i32 = arith.constant 0 : i32
    %c0_i32_0 = arith.constant 0 : i32
    %c0_i32_1 = arith.constant 0 : i32
    return %c0_i32, %c0_i32_0 : i32, i32
  }
  func.func @transform_12(%arg0: i32) -> (i32, i32) {
    %c0_i32 = arith.constant 0 : i32
    %c0_i32_0 = arith.constant 0 : i32
    %c0_i32_1 = arith.constant 0 : i32
    return %c0_i32, %c0_i32_0 : i32, i32
  }
  func.func @transform_13(%arg0: i32) -> (i32, i32) {
    %c0_i32 = arith.constant 0 : i32
    %c0_i32_0 = arith.constant 0 : i32
    %c0_i32_1 = arith.constant 0 : i32
    return %c0_i32, %c0_i32_0 : i32, i32
  }
  func.func @transform_14(%arg0: i32) -> (i32, i32) {
    %c0_i32 = arith.constant 0 : i32
    %c0_i32_0 = arith.constant 0 : i32
    %c0_i32_1 = arith.constant 0 : i32
    return %c0_i32, %c0_i32_0 : i32, i32
  }
}

</mosaic_0001>

<bundles_post_ra>
// kernel: forward.1
= control target key start
LH: loop header
LB: loop body
LE: loop exit
PB: predicated region body
PF: predicated region fallthrough
CT: control target
= control target key end

     0   :  { %vm60_vm0 = vcmask 261120   ;;  %v2035_v25 = vmov 0.0|0.0   ;;  %vm2036_vm1 = vmmov 0   ;;  %v2037_v36 = vmov 0.0   ;;  %s2419_s3 = inlined_call_operand.vmem [shape: f32[32,32], index: 3, kind: input, shape index: {}]   ;;  %s2420_s0 = inlined_call_operand.vmem [shape: f32[16,32], index: 0, kind: input, shape index: {}]   ;;  %s2421_s5 = inlined_call_operand.vmem [shape: f32[32,32], index: 5, kind: input, shape index: {}]   ;;  %s2422_s4 = inlined_call_operand.vmem [shape: f32[1,32], index: 4, kind: input, shape index: {}]   ;;  %s2423_s1 = inlined_call_operand.vmem [shape: f32[16,32], index: 1, kind: input, shape index: {}]   ;;  %s2424_s2 = inlined_call_operand.vmem [shape: f32[16,32], index: 2, kind: input, shape index: {}]   ;;  %s2425_s7 = inlined_call_operand.vmem [shape: f32[32,128], index: 7, kind: input, shape index: {}]   ;;  %s2426_s8 = inlined_call_operand.vmem [shape: f32[32,128], index: 8, kind: input, shape index: {}]   ;;  %s2427_s6 = inlined_call_operand.vmem [shape: f32[1,32], index: 6, kind: input, shape index: {}]   ;;  %s2428_s9 = inlined_call_operand.vmem [shape: f32[1,128], index: 9, kind: input, shape index: {}]   ;;  %s2429_s10 = inlined_call_operand.vmem [shape: f32[32,64], index: 10, kind: input, shape index: {}]   ;;  %s2430_s12 = inlined_call_operand.vmem [shape: f32[64,128], index: 12, kind: input, shape index: {}]   ;;  %s2431_s11 = inlined_call_operand.vmem [shape: f32[1,64], index: 11, kind: input, shape index: {}]   ;;  %s2432_s13 = inlined_call_operand.vmem [shape: f32[1,128], index: 13, kind: input, shape index: {}]   ;;  %s2433_s14 = inlined_call_operand.vmem [shape: f32[16,128], index: 14, kind: output, shape index: {}]  }
   0x1   :  { %v49_v0 = vld [vmem:[%s2419_s3] sm:$0xff]  ;;  %v50_v1 = vld [vmem:[%s2419_s3 + $0x8] sm:$0xff]  ;;  %v51_v2 = vld [vmem:[%s2419_s3 + $0x10] sm:$0xff]  ;;  %vm438_vm2 = vcmask 1041408   ;;  %vm440_vm3 = vcmask 1043456   ;;  %vm442_vm4 = vcmask 1045504  }
   0x2   :  { %v1830_v3 = vpack.c.bf16 %v50_v1, %v49_v0  ;;  %v52_v4 = vld [vmem:[%s2419_s3 + $0x18] sm:$0xff]  ;;  %v47_v5 = vld [vmem:[%s2420_s0] sm:$0xff]  ;;  %v147_v8 = vld [vmem:[%s2421_s5 + $0x8] sm:$0xff]  ;;  %vm570_vm6 = vcmask 254976   ;;  %vm680_vm7 = vcmask 257026   ;;  %vm906_vm8 = vcmask 261126  }
   0x3   :  { %v1834_v6 = vpack.c.bf16 %v52_v4, %v51_v2  ;;  %1681 = vmatprep.mubr.msk.f32.mxu1 %vm60_vm0, %v47_v5  ;;  %v146_v7 = vld [vmem:[%s2421_s5] sm:$0xff]  ;;  %v48_v10 = vld [vmem:[%s2420_s0 + $0x8] sm:$0xff]  ;;  %v148_v11 = vld [vmem:[%s2421_s5 + $0x10] sm:$0xff]  ;;  %vm793_vm9 = vcmask 259076   ;;  %vm1467_vm11 = vcmask 523264  }
   0x4   :  { %1831 = vmatprep.subr.bf16.mxu1 %v1830_v3  ;;  %v1838_v9 = vpack.c.bf16 %v147_v8, %v146_v7  ;;  %v149_v12 = vld [vmem:[%s2421_s5 + $0x18] sm:$0xff]  ;;  %v1555_v14 = vld [vmem:[%s2422_s4] ss:$0 sm:$0xff]  ;;  %v2168_v20 = vld [vmem:[%s2423_s1 + $0x8] sm:$0xff]  ;;  %s2039_s5 = smov 32  }
   0x5   :  { %1833 = vmatpush3.bf16.msra.mxu1 %v1830_v3  ;;  %v1842_v13 = vpack.c.bf16 %v149_v12, %v148_v11  ;;  %v2157_v19 = vld [vmem:[%s2423_s1] sm:$0xff]  ;;  %v2182_v22 = vld [vmem:[%s2424_s2 + $0x8] sm:$0xff]  ;;  %v338_v26 = vld [vmem:[%s2425_s7 + $0x10] sm:$0xff] }
   0x6   :  { %1835 = vmatprep.subr.bf16.mxu1 %v1834_v6  ;;  %v2173_v21 = vld [vmem:[%s2424_s2] sm:$0xff]  ;;  %v337_v24 = vld [vmem:[%s2425_s7 + $0x8] sm:$0xff]  ;;  %v339_v28 = vld [vmem:[%s2425_s7 + $0x18] sm:$0xff] }
   0x7   :  { %v336_v23 = vld [vmem:[%s2425_s7] sm:$0xff]  ;;  %v465_v30 = vld [vmem:[%s2426_s8 + $0x8] sm:$0xff]  ;;  %v1850_v31 = vpack.c.bf16 %v339_v28, %v338_v26  ;;  %v466_v33 = vld [vmem:[%s2426_s8 + $0x10] sm:$0xff] }
   0x8   :  { %v1846_v27 = vpack.c.bf16 %v337_v24, %v336_v23  ;;  %v464_v29 = vld [vmem:[%s2426_s8] sm:$0xff]  ;;  %v467_v34 = vld [vmem:[%s2426_s8 + $0x18] sm:$0xff] }
   0x9   :  { %1837 = vmatpush3.bf16.msra.mxu1 %v1834_v6  ;;  %v2205_v32 = vpack.c.bf16 %v465_v30, %v464_v29  ;;  %v2216_v35 = vpack.c.bf16 %v467_v34, %v466_v33  ;;  %v1558_v37 = vld [vmem:[%s2427_s6] ss:$0 sm:$0xff] }
   0xa   :  { %1839 = vmatprep.subr.bf16.mxu1 %v1838_v9  ;;  %1847 = vmatprep.subr.bf16.mxu0 %v1846_v27 }
   0xb   :  { %1849 = vmatpush3.bf16.msra.mxu0 %v1846_v27 }
   0xc   :  { %1682 = vmatmul.mubr.msk.f32.vlgmr.msra.gmra.mrb[0].mxu1 %vm60_vm0, %v48_v10  ;;  %1851 = vmatprep.subr.bf16.mxu0 %v1850_v31 }
   0xd   :  { %1841 = vmatpush3.bf16.msra.mxu1 %v1838_v9 }
   0xe   :  { %1843 = vmatprep.subr.bf16.mxu1 %v1842_v13 }
   0xf   :  { %1853 = vmatpush3.bf16.msra.mxu0 %v1850_v31 }
  0x10   :  { %1860 = vmatprep.subr.bf16.mxu0 %v2035_v25 }
  0x11   :  { %1845 = vmatpush3.bf16.msra.mxu1 %v1842_v13 }
  0x12   :  { %1854 = vmatprep.subr.bf16.mxu1 %v2035_v25 }
  0xdf   :  { %v1683_v15 = vpop.f32.mrb[0].mxu1 }
  0xe0   :  { %v133_v16 = vpop.f32.mrb[1].mxu1  ;;  %v2152_v18 = vadd.f32 %v1683_v15, %v1555_v14 }
  0xe1   :  { %v2150_v17 = vadd.f32 %v1555_v14, %v133_v16 }
  0xe3   :  { %1692 = vmatprep.mubr.msk.f32.mxu1 %vm60_vm0, %v2150_v17 }
  0xe4   :  { %1693 = vmatmul.mubr.msk.f32.vlgmr.msra.gmra.mrb[2].mxu1 %vm60_vm0, %v2152_v18 }
  0xe5   :  { %1695 = vmatprep.mubr.msk.f32.mxu1 %vm60_vm0, %v2157_v19  ;;  %1856 = vmatpush3.bf16.msra.mxu1 %v2205_v32 }
  0xe6   :  { %1857 = vmatprep.subr.bf16.mxu1 %v2035_v25 }
  0xe8   :  { %1696 = vmatmul.mubr.msk.f32.gmra.mrb[4].mxu1 %vm60_vm0, %v2168_v20 }
  0xe9   :  { %1698 = vmatprep.mubr.msk.f32.mxu1 %vm60_vm0, %v2173_v21  ;;  %1859 = vmatpush3.bf16.msra.mxu1 %v2216_v35 }
  0xea   :  { %1866 = vmatprep.subr.bf16.mxu1 %v2035_v25 }
  0xec   :  { %1699 = vmatmul.mubr.msk.f32.gmra.mrb[6].mxu1 %vm60_vm0, %v2182_v22 }
  0xed   :  { %1720 = vmatprep.mubr.msk.f32.mxu1 %vm2036_vm1, %v2037_v36 }
  0xf0   :  { %1721 = vmatmul.mubr.f32.vlgmr.msra.gmra.mrb[8].mxu1 %v2037_v36 }
  0xf1   :  { %1868 = vmatpush3.bf16.msra.mxu1 %v2205_v32  ;;  %1742 = vmatprep.mubr.msk.f32.mxu1 %vm2036_vm1, %v2037_v36 }
  0xf2   :  { %1869 = vmatprep.subr.bf16.mxu1 %v2035_v25 }
  0xf5   :  { %1871 = vmatpush3.bf16.msra.mxu1 %v2216_v35 }
  0xf6   :  { %1878 = vmatprep.subr.bf16.mxu1 %v2035_v25 }
 0x1b7   :  { %v1694_v38 = vpop.f32.mrb[2].mxu1 }
 0x1b8   :  { %v247_v39 = vadd.f32 %v1694_v38, %v1558_v37  ;;  %v241_v40 = vpop.f32.mrb[3].mxu1 }
 0x1b9   :  { %v242_v41 = vadd.f32 %v1558_v37, %v241_v40 }
 0x1ba   :  { %v1566_v42 = vmul.f32 -1.442695, %v247_v39 }
 0x1bb   :  { %v1565_v43 = vmul.f32 -1.442695, %v242_v41  ;;  %v1697_v44 = vpop.f32.mrb[4].mxu1 }
 0x1bc   :  { %1931 = vpow2.f32 %v1566_v42  ;;  %v257_v45 = vadd.f32 %v1697_v44, %v1558_v37  ;;  %v251_v46 = vpop.f32.mrb[5].mxu1 }
 0x1bd   :  { %1933 = vpow2.f32 %v1565_v43  ;;  %v252_v47 = vadd.f32 %v1558_v37, %v251_v46 }
 0x1be   :  { %v1568_v48 = vmul.f32 -1.442695, %v257_v45 }
 0x1bf   :  { %v1567_v49 = vmul.f32 -1.442695, %v252_v47  ;;  %v1700_v50 = vpop.f32.mrb[6].mxu1 }
 0x1c0   :  { %1935 = vpow2.f32 %v1568_v48  ;;  %v267_v51 = vadd.f32 %v1700_v50, %v1558_v37  ;;  %v261_v52 = vpop.f32.mrb[7].mxu1  ;;  %v1571_v48 = vld [vmem:[%s2428_s9] ss:$0 sm:$0xff]  ;;  %s2038_s9 = smov 64  }
 0x1c1   :  { %1937 = vpow2.f32 %v1567_v49  ;;  %v262_v53 = vadd.f32 %v1558_v37, %v261_v52 }
 0x1c2   :  { %v1570_v54 = vmul.f32 -1.442695, %v267_v51 }
 0x1c3   :  { %v1569_v55 = vmul.f32 -1.442695, %v262_v53 }
 0x1c4   :  { %1939 = vpow2.f32 %v1570_v54 }
 0x1c5   :  { %1941 = vpow2.f32 %v1569_v55 }
 0x1c6   :  { %v1932_v56 = vpop.eup %1931 }
 0x1c7   :  { %v1934_v57 = vpop.eup %1933  ;;  %v289_v58 = vadd.f32 1.0, %v1932_v56 }
 0x1c8   :  { %v288_v59 = vadd.f32 1.0, %v1934_v57 }
 0x1c9   :  { %1943 = vrcp.f32 %v289_v58 }
 0x1ca   :  { %v1936_v60 = vpop.eup %1935  ;;  %1945 = vrcp.f32 %v288_v59 }
 0x1cb   :  { %v1938_v61 = vpop.eup %1937  ;;  %v291_v62 = vadd.f32 1.0, %v1936_v60 }
 0x1cc   :  { %v290_v63 = vadd.f32 1.0, %v1938_v61 }
 0x1cd   :  { %1947 = vrcp.f32 %v291_v62 }
 0x1ce   :  { %v1940_v0 = vpop.eup %1939  ;;  %1949 = vrcp.f32 %v290_v63 }
 0x1cf   :  { %v1942_v1 = vpop.eup %1941  ;;  %v293_v2 = vadd.f32 1.0, %v1940_v0 }
 0x1d0   :  { %v292_v3 = vadd.f32 1.0, %v1942_v1 }
 0x1d1   :  { %1951 = vrcp.f32 %v293_v2 }
 0x1d2   :  { %1953 = vrcp.f32 %v292_v3 }
 0x1d3   :  { %v1944_v4 = vpop.eup %1943 }
 0x1d4   :  { %v1946_v5 = vpop.eup %1945  ;;  %v308_v6 = vmul.f32 1.442695, %v1944_v4 }
 0x1d5   :  { %v306_v7 = vmul.f32 1.442695, %v1946_v5 }
 0x1d6   :  { %1955 = vpow2.f32 %v308_v6 }
 0x1d7   :  { %v1948_v8 = vpop.eup %1947  ;;  %1957 = vpow2.f32 %v306_v7 }
 0x1d8   :  { %v1950_v9 = vpop.eup %1949  ;;  %v312_v10 = vmul.f32 1.442695, %v1948_v8 }
 0x1d9   :  { %v310_v11 = vmul.f32 1.442695, %v1950_v9 }
 0x1da   :  { %1959 = vpow2.f32 %v312_v10 }
 0x1db   :  { %v1952_v12 = vpop.eup %1951  ;;  %1961 = vpow2.f32 %v310_v11 }
 0x1dc   :  { %v1954_v13 = vpop.eup %1953  ;;  %v316_v14 = vmul.f32 1.442695, %v1952_v12 }
 0x1dd   :  { %v314_v15 = vmul.f32 1.442695, %v1954_v13 }
 0x1de   :  { %1963 = vpow2.f32 %v316_v14 }
 0x1df   :  { %1965 = vpow2.f32 %v314_v15 }
 0x1e0   :  { %v1956_v16 = vpop.eup %1955 }
 0x1e1   :  { %v1958_v23 = vpop.eup %1957  ;;  %v325_v28 = vmul.f32 %v1956_v16, %v2152_v18 }
 0x1e2   :  { %v324_v31 = vmul.f32 %v1958_v23, %v2150_v17 }
 0x1e4   :  { %v1960_v24 = vpop.eup %1959 }
 0x1e5   :  { %v1962_v26 = vpop.eup %1961  ;;  %v319_v27 = vadd.f32 %v1960_v24, %v1956_v16  ;;  %v327_v29 = vmul.f32 %v1960_v24, %v2168_v20 }
 0x1e6   :  { %v318_v30 = vadd.f32 %v1962_v26, %v1958_v23  ;;  %v326_v33 = vmul.f32 %v1962_v26, %v2157_v19  ;;  %v537_v19 = vpop.f32.mrb[8].mxu1 }
 0x1e7   :  { %v329_v34 = vadd.f32 %v327_v29, %v325_v28 }
 0x1e8   :  { %v1964_v37 = vpop.eup %1963  ;;  %v328_v38 = vadd.f32 %v326_v33, %v324_v31 }
 0x1e9   :  { %v1966_v39 = vpop.eup %1965  ;;  %v321_v40 = vadd.f32 %v1964_v37, %v319_v27  ;;  %v331_v41 = vmul.f32 %v1964_v37, %v2182_v22  ;;  %v447_v22 = vlaneseq }
 0x1ea   :  { %v320_v42 = vadd.f32 %v1966_v39, %v318_v30  ;;  %v330_v43 = vmul.f32 %v1966_v39, %v2173_v21  ;;  %v1722_v21 = vpop.f32.mrb[9].mxu1 }
 0x1eb   :  { %1967 = vrcp.f32 %v321_v40  ;;  %v333_v44 = vadd.f32 %v331_v41, %v329_v34  ;;  %v2246_v47 = vand.u32 127, %v447_v22 }
 0x1ec   :  { %1969 = vrcp.f32 %v320_v42  ;;  %v332_v18 = vadd.f32 %v330_v43, %v328_v38 }
 0x1ed   :  { %v453_v52 = vand.u32 31, %v2246_v47  ;;  %vm1351_vm10 = vcmp.lt.s32.totalorder %v2246_v47, 16  ;;  %v1589_v47 = vld [vmem:[%s2431_s11] ss:$0 sm:$0xff] }
 0x1ef   :  { %vm461_vm5 = vcmp.lt.s32.totalorder %v453_v52, 16 }
 0x1f5   :  { %v1968_v20 = vpop.eup %1967 }
 0x1f6   :  { %v1970_v45 = vpop.eup %1969  ;;  %v335_v46 = vmul.f32 %v1968_v20, %v333_v44 }
 0x1f7   :  { %v334_v17 = vmul.f32 %v1970_v45, %v332_v18 }
 0x1f9   :  { %1709 = vmatprep.mubr.msk.f32.mxu0 %vm60_vm0, %v334_v17 }
 0x1fa   :  { %1710 = vmatmul.mubr.msk.f32.vlgmr.msra.gmra.mrb[0].mxu0 %vm60_vm0, %v335_v46 }
 0x1fb   :  { %1862 = vmatpush3.bf16.msra.mxu0 %v2205_v32  ;;  %1731 = vmatprep.mubr.msk.f32.mxu0 %vm2036_vm1, %v2037_v36 }
 0x1fc   :  { %1863 = vmatprep.subr.bf16.mxu0 %v2035_v25 }
 0x1ff   :  { %1865 = vmatpush3.bf16.msra.mxu0 %v2216_v35 }
 0x200   :  { %1872 = vmatprep.subr.bf16.mxu0 %v2035_v25 }
 0x2cd   :  { %v1711_v49 = vpop.f32.mrb[0].mxu0 }
 0x2ce   :  { %v425_v50 = vadd.f32 %v1711_v49, %v1571_v48  ;;  %v419_v51 = vpop.f32.mrb[1].mxu0 }
 0x2cf   :  { %v420_v53 = vadd.f32 %v1571_v48, %v419_v51 }
 0x2d0   :  { %v429_v54 = vrot.slane %v425_v50, 6  ;;  %v431_v55 = vrot.slane %v425_v50, 2 }
 0x2d1   :  { %v434_v56 = vrot.slane %v420_v53, 6  ;;  %v436_v57 = vrot.slane %v420_v53, 2 }
 0x2d2   :  { %v439_v58 = vsel %vm438_vm2, %v429_v54, %v431_v55 }
 0x2d3   :  { %v444_v59 = vsel %vm438_vm2, %v434_v56, %v436_v57  ;;  %v441_v60 = vsel %vm440_vm3, %v439_v58, %v429_v54 }
 0x2d4   :  { %v443_v61 = vsel %vm442_vm4, %v441_v60, %v431_v55  ;;  %v445_v62 = vsel %vm440_vm3, %v444_v59, %v434_v56 }
 0x2d5   :  { %v2252_v63 = vsel %vm461_vm5, %v420_v53, %v443_v61  ;;  %v446_v0 = vsel %vm442_vm4, %v445_v62, %v436_v57 }
 0x2d6   :  { %v541_v1 = vadd.f32 %v537_v19, %v2252_v63  ;;  %v2255_v2 = vsel %vm461_vm5, %v425_v50, %v446_v0 }
 0x2d8   :  { %1971 = vtanh.f32 %v541_v1  ;;  %v1574_v4 = vmul.f32 -1.442695, %v541_v1 }
 0x2da   :  { %1973 = vpow2.f32 %v1574_v4 }
 0x2e2   :  { %v1972_v3 = vpop.eup %1971 }
 0x2e3   :  { %551 = vrot.lane.b32.xlu0 %v1972_v3, %s2038_s9 }
 0x2e4   :  { %v1974_v5 = vpop.eup %1973 }
 0x2e5   :  { %v545_v6 = vadd.f32 1.0, %v1974_v5 }
 0x2e7   :  { %1975 = vrcp.f32 %v545_v6 }
 0x2f1   :  { %v1976_v7 = vpop.eup %1975 }
 0x2f2   :  { %v549_v10 = vmul.f32 0.0, %v1976_v7 }
 0x355   :  { %v552_v8 = vpop.permute.xlu0 %551 }
 0x356   :  { %v554_v9 = vmul.f32 %v1976_v7, %v552_v8 }
 0x358   :  { %556 = vrot.lane.b32.xlu0 %v554_v9, %s2039_s5 }
 0x3ca   :  { %v557_v11 = vpop.permute.xlu0 %556 }
 0x3cb   :  { %v559_v12 = vadd.f32 %v557_v11, %v549_v10 }
 0x3cd   :  { %1977 = vtanh.f32 %v559_v12  ;;  %v657_v38 = vrot.slane %v559_v12, 6 }
 0x3d7   :  { %v1978_v13 = vpop.eup %1977 }
 0x3d8   :  { %562 = vrot.lane.b32.xlu1 %v1978_v13, %s2038_s9 }
 0x44a   :  { %v563_v14 = vpop.permute.xlu1 %562 }
 0x44b   :  { %v565_v15 = vmul.f32 %v1976_v7, %v563_v14 }
 0x44d   :  { %567 = vrot.lane.b32.xlu1 %v565_v15, %s2039_s5 }
 0x4bf   :  { %v568_v16 = vpop.permute.xlu1 %567 }
 0x4c0   :  { %571 = vst.msk [vmem:[#allocation2] sm:$0x3] %vm570_vm6, %v568_v16  ;;  %572 = vst.msk [vmem:[#allocation3 + $0xe] sm:$0x3] %vm570_vm6, %v568_v16  ;;  %1732 = vmatmul.mubr.msk.f32.vlgmr.msra.gmra.mrb[2].mxu0 %vm60_vm0, %v568_v16 }
 0x4c1   :  { %1874 = vmatpush3.bf16.msra.mxu0 %v2205_v32  ;;  %1753 = vmatprep.mubr.msk.f32.mxu0 %vm2036_vm1, %v2037_v36 }
 0x4c2   :  { %1875 = vmatprep.subr.bf16.mxu0 %v2035_v25 }
 0x4c5   :  { %1877 = vmatpush3.bf16.msra.mxu0 %v2216_v35 }
 0x4c6   :  { %1884 = vmatprep.subr.bf16.mxu0 %v2035_v25 }
 0x593   :  { %v641_v23 = vpop.f32.mrb[2].mxu0 }
 0x594   :  { %v646_v24 = vrot.slane %v641_v23, 6  ;;  %v1733_v26 = vpop.f32.mrb[3].mxu0 }
 0x596   :  { %v648_v27 = vadd.f32 %v646_v24, %v2252_v63 }
 0x598   :  { %1979 = vtanh.f32 %v648_v27  ;;  %v1576_v29 = vmul.f32 -1.442695, %v648_v27 }
 0x59a   :  { %1981 = vpow2.f32 %v1576_v29 }
 0x5a2   :  { %v1980_v28 = vpop.eup %1979 }
 0x5a3   :  { %661 = vrot.lane.b32.xlu0 %v1980_v28, %s2038_s9 }
 0x5a4   :  { %v1982_v30 = vpop.eup %1981 }
 0x5a5   :  { %v652_v31 = vadd.f32 1.0, %v1982_v30 }
 0x5a7   :  { %1983 = vrcp.f32 %v652_v31 }
 0x5b1   :  { %v1984_v33 = vpop.eup %1983 }
 0x5b2   :  { %v659_v39 = vmul.f32 %v1984_v33, %v657_v38 }
 0x615   :  { %v662_v34 = vpop.permute.xlu0 %661 }
 0x616   :  { %v664_v37 = vmul.f32 %v1984_v33, %v662_v34 }
 0x618   :  { %666 = vrot.lane.b32.xlu1 %v664_v37, %s2039_s5 }
 0x68a   :  { %v667_v40 = vpop.permute.xlu1 %666 }
 0x68b   :  { %v669_v41 = vadd.f32 %v667_v40, %v659_v39 }
 0x68d   :  { %1985 = vtanh.f32 %v669_v41  ;;  %v770_v53 = vrot.slane %v669_v41, 6 }
 0x697   :  { %v1986_v42 = vpop.eup %1985 }
 0x698   :  { %672 = vrot.lane.b32.xlu0 %v1986_v42, %s2038_s9 }
 0x70a   :  { %v673_v43 = vpop.permute.xlu0 %672 }
 0x70b   :  { %v2274_v44 = vmul.f32 %v1984_v33, %v673_v43 }
 0x70d   :  { %v683_v18 = vrot.slane %v2274_v44, 2 }
 0x70f   :  { %684 = vrot.lane.b32.xlu1 %v683_v18, %s2039_s5 }
 0x781   :  { %v685_v20 = vpop.permute.xlu1 %684 }
 0x782   :  { %1743 = vmatmul.mubr.msk.f32.vlgmr.msra.gmra.mrb[10].mxu1 %vm60_vm0, %v685_v20 }
 0x783   :  { %1880 = vmatpush3.bf16.msra.mxu1 %v2205_v32  ;;  %1764 = vmatprep.mubr.msk.f32.mxu1 %vm2036_vm1, %v2037_v36 }
 0x784   :  { %1881 = vmatprep.subr.bf16.mxu1 %v2035_v25 }
 0x787   :  { %1883 = vmatpush3.bf16.msra.mxu1 %v2216_v35 }
 0x788   :  { %1890 = vmatprep.subr.bf16.mxu1 %v2035_v25 }
 0x855   :  { %v754_v45 = vpop.f32.mrb[10].mxu1 }
 0x856   :  { %v759_v46 = vrot.slane %v754_v45, 4  ;;  %v1744_v17 = vpop.f32.mrb[11].mxu1 }
 0x858   :  { %v761_v19 = vadd.f32 %v759_v46, %v2252_v63 }
 0x85a   :  { %1987 = vtanh.f32 %v761_v19  ;;  %v1578_v22 = vmul.f32 -1.442695, %v761_v19 }
 0x85c   :  { %1989 = vpow2.f32 %v1578_v22 }
 0x864   :  { %v1988_v21 = vpop.eup %1987 }
 0x865   :  { %774 = vrot.lane.b32.xlu0 %v1988_v21, %s2038_s9 }
 0x866   :  { %v1990_v48 = vpop.eup %1989 }
 0x867   :  { %v765_v49 = vadd.f32 1.0, %v1990_v48 }
 0x869   :  { %1991 = vrcp.f32 %v765_v49 }
 0x873   :  { %v1992_v50 = vpop.eup %1991 }
 0x874   :  { %v772_v54 = vmul.f32 %v1992_v50, %v770_v53 }
 0x8d7   :  { %v775_v51 = vpop.permute.xlu0 %774 }
 0x8d8   :  { %v777_v52 = vmul.f32 %v1992_v50, %v775_v51 }
 0x8da   :  { %779 = vrot.lane.b32.xlu1 %v777_v52, %s2039_s5 }
 0x94c   :  { %v780_v55 = vpop.permute.xlu1 %779 }
 0x94d   :  { %v782_v56 = vadd.f32 %v780_v55, %v772_v54 }
 0x94f   :  { %1993 = vtanh.f32 %v782_v56  ;;  %v883_v11 = vrot.slane %v782_v56, 6 }
 0x959   :  { %v1994_v57 = vpop.eup %1993 }
 0x95a   :  { %785 = vrot.lane.b32.xlu0 %v1994_v57, %s2038_s9 }
 0x9cc   :  { %v786_v58 = vpop.permute.xlu0 %785 }
 0x9cd   :  { %v2289_v59 = vmul.f32 %v1992_v50, %v786_v58 }
 0x9cf   :  { %v796_v60 = vrot.slane %v2289_v59, 4 }
 0x9d1   :  { %797 = vrot.lane.b32.xlu1 %v796_v60, %s2039_s5 }
 0xa43   :  { %v798_v61 = vpop.permute.xlu1 %797 }
 0xa44   :  { %1754 = vmatmul.mubr.msk.f32.vlgmr.msra.gmra.mrb[4].mxu0 %vm60_vm0, %v798_v61 }
 0xa45   :  { %1886 = vmatpush3.bf16.msra.mxu0 %v2205_v32  ;;  %1775 = vmatprep.mubr.msk.f32.mxu0 %vm2036_vm1, %v2037_v36 }
 0xa46   :  { %1887 = vmatprep.subr.bf16.mxu0 %v2035_v25 }
 0xa49   :  { %1889 = vmatpush3.bf16.msra.mxu0 %v2216_v35 }
 0xa4a   :  { %1896 = vmatprep.subr.bf16.mxu0 %v2035_v25 }
 0xb17   :  { %v867_v62 = vpop.f32.mrb[4].mxu0 }
 0xb18   :  { %v872_v0 = vrot.slane %v867_v62, 2  ;;  %v1755_v1 = vpop.f32.mrb[5].mxu0 }
 0xb1a   :  { %v874_v3 = vadd.f32 %v872_v0, %v2252_v63 }
 0xb1c   :  { %1995 = vtanh.f32 %v874_v3  ;;  %v1580_v5 = vmul.f32 -1.442695, %v874_v3 }
 0xb1e   :  { %1997 = vpow2.f32 %v1580_v5 }
 0xb26   :  { %v1996_v4 = vpop.eup %1995 }
 0xb27   :  { %887 = vrot.lane.b32.xlu0 %v1996_v4, %s2038_s9 }
 0xb28   :  { %v1998_v6 = vpop.eup %1997 }
 0xb29   :  { %v878_v7 = vadd.f32 1.0, %v1998_v6 }
 0xb2b   :  { %1999 = vrcp.f32 %v878_v7 }
 0xb35   :  { %v2000_v8 = vpop.eup %1999 }
 0xb36   :  { %v885_v12 = vmul.f32 %v2000_v8, %v883_v11 }
 0xb99   :  { %v888_v9 = vpop.permute.xlu0 %887 }
 0xb9a   :  { %v890_v10 = vmul.f32 %v2000_v8, %v888_v9 }
 0xb9c   :  { %892 = vrot.lane.b32.xlu1 %v890_v10, %s2039_s5 }
 0xc0e   :  { %v893_v13 = vpop.permute.xlu1 %892 }
 0xc0f   :  { %v895_v14 = vadd.f32 %v893_v13, %v885_v12 }
 0xc11   :  { %2001 = vtanh.f32 %v895_v14  ;;  %v993_v39 = vrot.slane %v895_v14, 6 }
 0xc1b   :  { %v2002_v63 = vpop.eup %2001 }
 0xc1c   :  { %898 = vrot.lane.b32.xlu0 %v2002_v63, %s2038_s9 }
 0xc8e   :  { %v899_v15 = vpop.permute.xlu0 %898 }
 0xc8f   :  { %v2304_v16 = vmul.f32 %v2000_v8, %v899_v15 }
 0xc91   :  { %v909_v23 = vrot.slane %v2304_v16, 6 }
 0xc93   :  { %910 = vrot.lane.b32.xlu1 %v909_v23, %s2039_s5 }
 0xd05   :  { %v911_v24 = vpop.permute.xlu1 %910 }
 0xd06   :  { %1765 = vmatmul.mubr.msk.f32.vlgmr.msra.gmra.mrb[12].mxu1 %vm60_vm0, %v911_v24 }
 0xd07   :  { %1892 = vmatpush3.bf16.msra.mxu1 %v2205_v32  ;;  %1786 = vmatprep.mubr.msk.f32.mxu1 %vm2036_vm1, %v2037_v36 }
 0xd08   :  { %1893 = vmatprep.subr.bf16.mxu1 %v2035_v25 }
 0xd0b   :  { %1895 = vmatpush3.bf16.msra.mxu1 %v2216_v35 }
 0xdd9   :  { %v980_v26 = vpop.f32.mrb[12].mxu1 }
 0xdda   :  { %v984_v27 = vadd.f32 %v980_v26, %v2255_v2  ;;  %v1766_v28 = vpop.f32.mrb[13].mxu1 }
 0xddc   :  { %2003 = vtanh.f32 %v984_v27  ;;  %v1582_v30 = vmul.f32 -1.442695, %v984_v27 }
 0xdde   :  { %2005 = vpow2.f32 %v1582_v30 }
 0xde6   :  { %v2004_v29 = vpop.eup %2003 }
 0xde7   :  { %997 = vrot.lane.b32.xlu0 %v2004_v29, %s2038_s9 }
 0xde8   :  { %v2006_v31 = vpop.eup %2005 }
 0xde9   :  { %v988_v33 = vadd.f32 1.0, %v2006_v31 }
 0xdeb   :  { %2007 = vrcp.f32 %v988_v33 }
 0xdf5   :  { %v2008_v34 = vpop.eup %2007 }
 0xdf6   :  { %v995_v40 = vmul.f32 %v2008_v34, %v993_v39 }
 0xe59   :  { %v998_v37 = vpop.permute.xlu0 %997 }
 0xe5a   :  { %v1000_v38 = vmul.f32 %v2008_v34, %v998_v37 }
 0xe5c   :  { %1002 = vrot.lane.b32.xlu1 %v1000_v38, %s2039_s5 }
 0xece   :  { %v1003_v41 = vpop.permute.xlu1 %1002 }
 0xecf   :  { %v1005_v42 = vadd.f32 %v1003_v41, %v995_v40 }
 0xed1   :  { %2009 = vtanh.f32 %v1005_v42 }
 0xedb   :  { %v2010_v43 = vpop.eup %2009 }
 0xedc   :  { %1008 = vrot.lane.b32.xlu0 %v2010_v43, %s2038_s9 }
 0xf4e   :  { %v1009_v18 = vpop.permute.xlu0 %1008 }
 0xf4f   :  { %v1011_v20 = vmul.f32 %v2008_v34, %v1009_v18  ;;  %v1358_v18 = vld [vmem:[%s2429_s10] sm:$0xff] }
 0xf51   :  { %1013 = vrot.lane.b32.xlu1 %v1011_v20, %s2039_s5  ;;  %v1359_v20 = vld [vmem:[%s2429_s10 + $0x8] sm:$0xff] }
 0xfc3   :  { %v1014_v45 = vpop.permute.xlu1 %1013 }
 0xfc4   :  { %1016 = vst.msk [vmem:[#allocation2 + $0x8] sm:$0x3] %vm570_vm6, %v1014_v45  ;;  %1017 = vst.msk [vmem:[#allocation3 + $0x6] sm:$0x3] %vm570_vm6, %v1014_v45  ;;  %1776 = vmatmul.mubr.msk.f32.vlgmr.msra.gmra.mrb[6].mxu0 %vm60_vm0, %v1014_v45  ;;  %v1902_v45 = vpack.c.bf16 %v1359_v20, %v1358_v18 }
 0xfc5   :  { %1898 = vmatpush3.bf16.msra.mxu0 %v2205_v32  ;;  %1797 = vmatprep.mubr.msk.f32.mxu0 %vm2036_vm1, %v2037_v36 }
 0xfc6   :  { %1899 = vmatprep.subr.bf16.mxu0 %v2035_v25  ;;  %v1102_v25 = vrot.slane %v1005_v42, 6  ;;  %1903 = vmatprep.subr.bf16.mxu1 %v1902_v45 }
 0xfc9   :  { %1901 = vmatpush3.bf16.msra.mxu0 %v2216_v35 }
0x1097   :  { %v1086_v46 = vpop.f32.mrb[6].mxu0 }
0x1098   :  { %v1091_v17 = vrot.slane %v1086_v46, 6  ;;  %v1777_v19 = vpop.f32.mrb[7].mxu0  ;;  %v1360_v46 = vld [vmem:[%s2429_s10 + $0x10] sm:$0xff] }
0x109a   :  { %v1093_v21 = vadd.f32 %v1091_v17, %v2255_v2 }
0x109c   :  { %2011 = vtanh.f32 %v1093_v21  ;;  %v1584_v48 = vmul.f32 -1.442695, %v1093_v21 }
0x109e   :  { %2013 = vpow2.f32 %v1584_v48  ;;  %v1453_v48 = vld [vmem:[%s2430_s12 + $0x8] sm:$0xff] }
0x10a6   :  { %v2012_v22 = vpop.eup %2011 }
0x10a7   :  { %1106 = vrot.lane.b32.xlu0 %v2012_v22, %s2038_s9  ;;  %v1452_v22 = vld [vmem:[%s2430_s12] sm:$0xff] }
0x10a8   :  { %v2014_v49 = vpop.eup %2013 }
0x10a9   :  { %v1097_v32 = vadd.f32 1.0, %v2014_v49  ;;  %v1454_v49 = vld [vmem:[%s2430_s12 + $0x10] sm:$0xff] }
0x10ab   :  { %2015 = vrcp.f32 %v1097_v32  ;;  %v1910_v32 = vpack.c.bf16 %v1453_v48, %v1452_v22 }
0x10ad   :  { %1911 = vmatprep.subr.bf16.mxu0 %v1910_v32 }
0x10b5   :  { %v2016_v50 = vpop.eup %2015 }
0x10b6   :  { %v1104_v35 = vmul.f32 %v2016_v50, %v1102_v25  ;;  %v1457_v25 = vld [vmem:[%s2430_s12 + $0x28] sm:$0xff] }
0x1119   :  { %v1107_v36 = vpop.permute.xlu0 %1106 }
0x111a   :  { %v1109_v51 = vmul.f32 %v2016_v50, %v1107_v36 }
0x111c   :  { %1111 = vrot.lane.b32.xlu1 %v1109_v51, %s2039_s5  ;;  %v1456_v51 = vld [vmem:[%s2430_s12 + $0x20] sm:$0xff] }
0x118e   :  { %v1112_v52 = vpop.permute.xlu1 %1111 }
0x118f   :  { %v1114_v53 = vadd.f32 %v1112_v52, %v1104_v35  ;;  %v1918_v52 = vpack.c.bf16 %v1457_v25, %v1456_v51 }
0x1191   :  { %2017 = vtanh.f32 %v1114_v53  ;;  %v1214_v9 = vrot.slane %v1114_v53, 6 }
0x119b   :  { %v2018_v54 = vpop.eup %2017 }
0x119c   :  { %1117 = vrot.lane.b32.xlu0 %v2018_v54, %s2038_s9 }
0x120e   :  { %v1118_v55 = vpop.permute.xlu0 %1117 }
0x120f   :  { %v2331_v56 = vmul.f32 %v2016_v50, %v1118_v55  ;;  %v1455_v50 = vld [vmem:[%s2430_s12 + $0x18] sm:$0xff] }
0x1210   :  { %v1914_v36 = vpack.c.bf16 %v1455_v50, %v1454_v49 }
0x1211   :  { %v1127_v57 = vrot.slane %v2331_v56, 2 }
0x1213   :  { %1128 = vrot.lane.b32.xlu1 %v1127_v57, %s2039_s5 }
0x1285   :  { %v1129_v58 = vpop.permute.xlu1 %1128 }
0x1286   :  { %1787 = vmatmul.mubr.msk.f32.vlgmr.msra.gmra.mrb[14].mxu1 %vm60_vm0, %v1129_v58 }
0x1287   :  { %1905 = vmatpush3.bf16.msra.mxu1 %v1902_v45 }
0x1359   :  { %v1198_v60 = vpop.f32.mrb[14].mxu1 }
0x135a   :  { %v1203_v61 = vrot.slane %v1198_v60, 4  ;;  %v1788_v62 = vpop.f32.mrb[15].mxu1 }
0x135b   :  { %v1458_v62 = vld [vmem:[%s2430_s12 + $0x30] sm:$0xff] }
0x135c   :  { %v1205_v0 = vadd.f32 %v1203_v61, %v2255_v2 }
0x135e   :  { %2019 = vtanh.f32 %v1205_v0  ;;  %v1586_v3 = vmul.f32 -1.442695, %v1205_v0  ;;  %v1459_v0 = vld [vmem:[%s2430_s12 + $0x38] sm:$0xff] }
0x1360   :  { %2021 = vpow2.f32 %v1586_v3 }
0x1368   :  { %v2020_v1 = vpop.eup %2019 }
0x1369   :  { %1218 = vrot.lane.b32.xlu0 %v2020_v1, %s2038_s9  ;;  %v1922_v1 = vpack.c.bf16 %v1459_v0, %v1458_v62 }
0x136a   :  { %v2022_v4 = vpop.eup %2021 }
0x136b   :  { %v1209_v5 = vadd.f32 1.0, %v2022_v4 }
0x136d   :  { %2023 = vrcp.f32 %v1209_v5 }
0x1377   :  { %v2024_v6 = vpop.eup %2023 }
0x1378   :  { %v1216_v10 = vmul.f32 %v2024_v6, %v1214_v9  ;;  %v1592_v9 = vld [vmem:[%s2432_s13] ss:$0 sm:$0xff] }
0x13db   :  { %v1219_v7 = vpop.permute.xlu0 %1218 }
0x13dc   :  { %v1221_v8 = vmul.f32 %v2024_v6, %v1219_v7 }
0x13de   :  { %1223 = vrot.lane.b32.xlu1 %v1221_v8, %s2039_s5 }
0x1450   :  { %v1224_v11 = vpop.permute.xlu1 %1223 }
0x1451   :  { %v1226_v12 = vadd.f32 %v1224_v11, %v1216_v10 }
0x1453   :  { %2025 = vtanh.f32 %v1226_v12 }
0x145d   :  { %v2026_v13 = vpop.eup %2025 }
0x145e   :  { %1229 = vrot.lane.b32.xlu0 %v2026_v13, %s2038_s9 }
0x14d0   :  { %v1230_v14 = vpop.permute.xlu0 %1229 }
0x14d1   :  { %v1232_v63 = vmul.f32 %v2024_v6, %v1230_v14 }
0x14d3   :  { %v1239_v15 = vrot.slane %v1232_v63, 4 }
0x14d5   :  { %1240 = vrot.lane.b32.xlu1 %v1239_v15, %s2039_s5 }
0x1547   :  { %v1241_v23 = vpop.permute.xlu1 %1240 }
0x1548   :  { %1798 = vmatmul.mubr.msk.f32.vlgmr.msra.gmra.mrb[8].mxu0 %vm60_vm0, %v1241_v23 }
0x1549   :  { %1913 = vmatpush3.bf16.msra.mxu0 %v1910_v32 }
0x154a   :  { %1915 = vmatprep.subr.bf16.mxu0 %v1914_v36 }
0x154d   :  { %1917 = vmatpush3.bf16.msra.mxu0 %v1914_v36 }
0x154e   :  { %1919 = vmatprep.subr.bf16.mxu0 %v1918_v52 }
0x1551   :  { %1921 = vmatpush3.bf16.msra.mxu0 %v1918_v52 }
0x1552   :  { %1923 = vmatprep.subr.bf16.mxu0 %v1922_v1 }
0x1555   :  { %1925 = vmatpush3.bf16.msra.mxu0 %v1922_v1 }
0x161b   :  { %v1310_v24 = vpop.f32.mrb[8].mxu0 }
0x161c   :  { %v1315_v26 = vrot.slane %v1310_v24, 2  ;;  %v1799_v27 = vpop.f32.mrb[9].mxu0 }
0x161e   :  { %v1317_v28 = vadd.f32 %v1315_v26, %v2255_v2  ;;  %v1326_v2 = vrot.slane %v1226_v12, 6 }
0x1620   :  { %2027 = vtanh.f32 %v1317_v28  ;;  %v1588_v30 = vmul.f32 -1.442695, %v1317_v28 }
0x1622   :  { %2029 = vpow2.f32 %v1588_v30 }
0x162a   :  { %v2028_v29 = vpop.eup %2027 }
0x162b   :  { %1330 = vrot.lane.b32.xlu0 %v2028_v29, %s2038_s9 }
0x162c   :  { %v2030_v31 = vpop.eup %2029 }
0x162d   :  { %v1321_v33 = vadd.f32 1.0, %v2030_v31 }
0x162f   :  { %2031 = vrcp.f32 %v1321_v33 }
0x1639   :  { %v2032_v34 = vpop.eup %2031 }
0x163a   :  { %v1328_v39 = vmul.f32 %v2032_v34, %v1326_v2 }
0x169d   :  { %v1331_v37 = vpop.permute.xlu0 %1330 }
0x169e   :  { %v1333_v38 = vmul.f32 %v2032_v34, %v1331_v37 }
0x16a0   :  { %1335 = vrot.lane.b32.xlu1 %v1333_v38, %s2039_s5 }
0x16a4   :  { %677 = vrot.lane.b32.xlu1 %v2274_v44, %s2039_s5 }
0x16a8   :  { %903 = vrot.lane.b32.xlu1 %v2304_v16, %s2039_s5 }
0x16ac   :  { %1234 = vrot.lane.b32.xlu1 %v1232_v63, %s2039_s5 }
0x1712   :  { %v1336_v40 = vpop.permute.xlu1 %1335 }
0x1713   :  { %v1338_v41 = vadd.f32 %v1336_v40, %v1328_v39 }
0x1715   :  { %2033 = vtanh.f32 %v1338_v41 }
0x1716   :  { %v678_v42 = vpop.permute.xlu1 %677 }
0x1717   :  { %681 = vst.msk [vmem:[#allocation2] sm:$0xc] %vm680_vm7, %v678_v42  ;;  %682 = vst.msk [vmem:[#allocation3 + $0xa] sm:$0xc] %vm680_vm7, %v678_v42 }
0x171a   :  { %v904_v43 = vpop.permute.xlu1 %903 }
0x171b   :  { %907 = vst.msk [vmem:[#allocation2] sm:$0xc0] %vm906_vm8, %v904_v43  ;;  %908 = vst.msk [vmem:[#allocation3 + $0x2] sm:$0xc0] %vm906_vm8, %v904_v43 }
0x171e   :  { %v1235_v44 = vpop.permute.xlu1 %1234 }
0x171f   :  { %v2034_v16 = vpop.eup %2033  ;;  %1237 = vst.msk [vmem:[#allocation2 + $0x8] sm:$0x30] %vm793_vm9, %v1235_v44  ;;  %1238 = vst.msk [vmem:[#allocation3 - $0x2] sm:$0x30] %vm793_vm9, %v1235_v44 }
0x1720   :  { %1341 = vrot.lane.b32.xlu0 %v2034_v16, %s2038_s9 }
0x1724   :  { %790 = vrot.lane.b32.xlu0 %v2289_v59, %s2039_s5  ;;  %v1361_v59 = vld [vmem:[%s2429_s10 + $0x18] sm:$0xff] }
0x1725   :  { %v1906_v17 = vpack.c.bf16 %v1361_v59, %v1360_v46 }
0x1727   :  { %1907 = vmatprep.subr.bf16.mxu1 %v1906_v17 }
0x1728   :  { %1122 = vrot.lane.b32.xlu0 %v2331_v56, %s2039_s5  ;;  %1909 = vmatpush3.bf16.msra.mxu1 %v1906_v17 }
0x1792   :  { %v1342_v19 = vpop.permute.xlu0 %1341 }
0x1793   :  { %v1344_v21 = vmul.f32 %v2032_v34, %v1342_v19 }
0x1795   :  { %1346 = vrot.lane.b32.xlu0 %v1344_v21, %s2039_s5 }
0x1796   :  { %v791_v35 = vpop.permute.xlu0 %790 }
0x1797   :  { %794 = vst.msk [vmem:[#allocation2] sm:$0x30] %vm793_vm9, %v791_v35  ;;  %795 = vst.msk [vmem:[#allocation3 + $0x6] sm:$0x30] %vm793_vm9, %v791_v35 }
0x179a   :  { %v1123_v53 = vpop.permute.xlu0 %1122 }
0x179b   :  { %1125 = vst.msk [vmem:[#allocation2 + $0x8] sm:$0xc] %vm680_vm7, %v1123_v53  ;;  %1126 = vst.msk [vmem:[#allocation3 + $0x2] sm:$0xc] %vm680_vm7, %v1123_v53 }
0x179e   :  { %v1352_v55 = vld [vmem:[#allocation2] sm:$0xff]  ;;  %v1355_v58 = vld [vmem:[#allocation3 + $0x8] sm:$0xff] }
0x1807   :  { %v1347_v54 = vpop.permute.xlu0 %1346 }
0x1808   :  { %1349 = vst.msk [vmem:[#allocation2 + $0x8] sm:$0xc0] %vm906_vm8, %v1347_v54  ;;  %1350 = vst.msk [vmem:[#allocation3 - $0x6] sm:$0xc0] %vm906_vm8, %v1347_v54 }
0x180f   :  { %v1354_v56 = vld [vmem:[#allocation3] sm:$0xff]  ;;  %v1353_v57 = vld [vmem:[#allocation2 + $0x8] sm:$0xff] }
0x1810   :  { %v1356_v60 = vsel %vm1351_vm10, %v1352_v55, %v1354_v56  ;;  %v1357_v61 = vsel %vm1351_vm10, %v1353_v57, %v1355_v58 }
0x1811   :  { %1808 = vmatprep.mubr.msk.f32.mxu1 %vm60_vm0, %v1356_v60 }
0x1812   :  { %1809 = vmatmul.mubr.msk.f32.vlgmr.msra.gmra.mrb[16].mxu1 %vm60_vm0, %v1357_v61 }
0x18e5   :  { %v1810_v3 = vpop.f32.mrb[16].mxu1 }
0x18e6   :  { %v1447_v4 = vadd.f32 %v1810_v3, %v1589_v47  ;;  %v1441_v5 = vpop.f32.mrb[17].mxu1 }
0x18e7   :  { %v1442_v6 = vadd.f32 %v1589_v47, %v1441_v5 }
0x18e8   :  { %v1451_v8 = vmax.f32 %v1447_v4, 0.0 }
0x18e9   :  { %v1450_v7 = vmax.f32 %v1442_v6, 0.0 }
0x18eb   :  { %1827 = vmatprep.mubr.msk.f32.mxu0 %vm1467_vm11, %v1450_v7 }
0x18ec   :  { %1828 = vmatmul.mubr.msk.f32.vlgmr.msra.gmra.mrb[10].mxu0 %vm1467_vm11, %v1451_v8 }
0x19bf   :  { %v1829_v10 = vpop.f32.mrb[10].mxu0 }
0x19c0   :  { %v1546_v11 = vadd.f32 %v1829_v10, %v1592_v9  ;;  %v1540_v12 = vpop.f32.mrb[11].mxu0 }
0x19c1   :  { %v1541_v13 = vadd.f32 %v1592_v9, %v1540_v12 }
0x19c2   :  { %1550 = vst [vmem:[%s2433_s14 + $0x8] sm:$0xff] %v1546_v11 }
0x19c3   :  { %1549 = vst [vmem:[%s2433_s14] sm:$0xff] %v1541_v13 }

</bundles_post_ra>
